<compile_context>
chip_gen: v6e
topology: v6e:2x2x1
jax: 0.10.0
libtpu: 0.0.40
codegen_flags: <defaults>
</compile_context>

<pallas_src>
import functools

import jax
import jax.numpy as jnp
from jax.experimental import pallas as pl
from jax.experimental.pallas import tpu as pltpu

_LANE = 128


def _round_up(n: int, m: int) -> int:
    return ((n + m - 1) // m) * m


def _vmem_budget_bytes(headroom_bytes: int = 8 << 20) -> int:
    """Per-core VMEM budget (generation-aware, with headroom)."""
    cap = 0
    try:
        cap = int(getattr(pltpu.get_tpu_info(), "vmem_capacity_bytes", 0))
    except Exception:
        cap = 0
    if cap <= 0:
        cap = 64 << 20          # conservative fallback: valid on v5e/v6e/v7x
    cap = min(cap, 128 << 20)   # sanity clamp
    return max(cap - headroom_bytes, 16 << 20)


def _choose_tile_h(h_out: int, w_itemsize: int, budget: int) -> int:
    """fc1 output-dim tile: full H if the weight block fits comfortably."""
    if 2 * h_out * h_out * w_itemsize <= budget // 2:
        return h_out                      # fully resident, single h step
    t = (budget * 2 // 5) // max(1, 2 * h_out * w_itemsize)
    t = max(_LANE, (t // _LANE) * _LANE)
    return min(t, _round_up(h_out, _LANE))


def _choose_tile_b(batch: int, h_in: int, tile_h: int, x_itemsize: int,
                   w_itemsize: int, budget: int) -> int:
    """Batch tile: as large as VMEM allows, but keep >= 2 grid steps (v7x)."""
    if batch <= 256:
        return max(16, _round_up(batch, 16))
    resident = 2 * h_in * tile_h * w_itemsize + 4 * tile_h * 4   # w1 + b1 + w2 blocks
    avail = max(budget - resident, 1 << 20)
    per_row = (2 * h_in * x_itemsize       # double-buffered x block
               + 2 * tile_h * 4            # in-kernel f32 intermediates (h, relu)
               + 3 * _LANE * 4)            # out blocks (x2) + y accumulator
    t = int(avail // per_row)
    t = max(256, (t // 256) * 256)
    t = min(t, 2048)
    t = min(t, _round_up(-(-batch // 2), 256))   # keep >= 2 batch tiles (megacore)
    return t


def _adversarial_kernel(x_ref, w1_ref, b1_ref, w2_ref, b2_ref, out_ref, acc_ref):
    # x: (TILE_B, H) input dtype; w1: (H, TILE_H) compute dtype (streamed along h);
    # b1/w2: (1, TILE_H) f32; b2: (1, 1) f32 scalar in SMEM; out: (TILE_B, 1);
    # acc: (TILE_B, 1) f32 VMEM scratch accumulating the fc2 dot over h tiles.
    j = pl.program_id(1)

    @pl.when(j == 0)
    def _():
        acc_ref[...] = jnp.zeros_like(acc_ref)

    x = x_ref[...]
    if x.dtype != w1_ref.dtype:
        x = x.astype(w1_ref.dtype)        # cast in VMEM, right before the MXU
    # fc1 slice on the MXU, f32 accumulation; ReLU is elementwise over the
    # output dim so tiling it is exact.
    h = jnp.dot(x, w1_ref[...], preferred_element_type=jnp.float32)
    h = jnp.maximum(h + b1_ref[...], 0.0)
    # fc2 (N=1): VPU multiply + XLU lane reduction; accumulate over h tiles.
    acc_ref[...] += jnp.sum(h * w2_ref[...], axis=-1, keepdims=True)

    @pl.when(j == pl.num_programs(1) - 1)
    def _():
        y = acc_ref[...] + b2_ref[0, 0]
        out_ref[...] = (1.0 / (1.0 + jnp.exp(-y))).astype(out_ref.dtype)


@functools.partial(jax.jit, static_argnames=("tile_b", "tile_h", "vmem_budget"))
def _adversarial_forward(x, w1, b1, w2, b2, *, tile_b, tile_h, vmem_budget):
    B, h_in = x.shape
    h_pad = w1.shape[1]
    num_h = h_pad // tile_h

    b_pad = _round_up(B, tile_b)
    if b_pad != B:
        x = jnp.pad(x, ((0, b_pad - B), (0, 0)))
    num_b = b_pad // tile_b

    # VMEM accounting: streamed blocks (double-buffered) + scratch + intermediates.
    need = (2 * tile_b * h_in * x.dtype.itemsize     # x blocks
            + 2 * h_in * tile_h * w1.dtype.itemsize  # w1 blocks
            + 4 * tile_h * 4                         # b1 + w2 blocks
            + 2 * tile_b * _LANE * 4                 # out blocks (lane-padded)
            + tile_b * _LANE * 4                     # y accumulator scratch
            + 2 * tile_b * tile_h * 4)               # in-kernel f32 intermediates
    vmem_limit = int(min(vmem_budget, max(int(need * 1.25) + (2 << 20), 32 << 20)))

    out = pl.pallas_call(
        _adversarial_kernel,
        out_shape=jax.ShapeDtypeStruct((b_pad, 1), x.dtype),
        grid_spec=pltpu.PrefetchScalarGridSpec(
            num_scalar_prefetch=0,
            grid=(num_b, num_h),
            in_specs=[
                pl.BlockSpec((tile_b, h_in), lambda i, j: (i, 0)),   # x: batch-streamed
                pl.BlockSpec((h_in, tile_h), lambda i, j: (0, j)),   # w1: h-streamed
                pl.BlockSpec((1, tile_h), lambda i, j: (0, j)),      # b1 slice
                pl.BlockSpec((1, tile_h), lambda i, j: (0, j)),      # w2 slice
                pl.BlockSpec(memory_space=pltpu.MemorySpace.SMEM),   # b2 scalar
            ],
            out_specs=pl.BlockSpec((tile_b, 1), lambda i, j: (i, 0)),
            scratch_shapes=[pltpu.VMEM((tile_b, 1), jnp.float32)],
        ),
        compiler_params=pltpu.CompilerParams(
            dimension_semantics=("parallel", "arbitrary"),
            vmem_limit_bytes=vmem_limit,
        ),
    )(x, w1, b1, w2, b2)
    return out[:B]


class AdversarialPallas:
    """Adversarial(hidden) forward: fc1 -> ReLU -> fc2 -> sigmoid.

    Weight prep (transpose / cast / pad) happens exactly once here, outside the
    jitted per-call path.  torch nn.Linear layouts expected:
    fc1_w (H, H) [out, in], fc1_b (H,), fc2_w (1, H), fc2_b (1,).
    """

    def __init__(self, fc1_w, fc1_b, fc2_w, fc2_b, *,
                 compute_dtype=jnp.bfloat16, tile_b=None, tile_h=None,
                 vmem_headroom_bytes=8 << 20):
        fc1_w = jnp.asarray(fc1_w)
        h_out, h_in = fc1_w.shape
        if h_out != h_in:
            raise ValueError("Adversarial fc1 must be square (hidden, hidden).")
        self.hidden = h_in
        self.compute_dtype = jnp.dtype(
            compute_dtype if compute_dtype is not None else fc1_w.dtype)
        self.vmem_budget = _vmem_budget_bytes(vmem_headroom_bytes)
        self.tile_h = int(tile_h) if tile_h else _choose_tile_h(
            h_out, self.compute_dtype.itemsize, self.vmem_budget)

        h_pad = _round_up(h_out, self.tile_h)
        # One-time prep: [out,in] -> [in,out], cast to the MXU compute dtype,
        # zero-pad the fc1 output dim so it tiles (padded cols contribute 0).
        w1 = fc1_w.T.astype(self.compute_dtype)
        b1 = jnp.asarray(fc1_b, jnp.float32).reshape(1, h_out)
        w2 = jnp.asarray(fc2_w, jnp.float32).reshape(1, h_out)
        if h_pad != h_out:
            pad = h_pad - h_out
            w1 = jnp.pad(w1, ((0, 0), (0, pad)))
            b1 = jnp.pad(b1, ((0, 0), (0, pad)))
            w2 = jnp.pad(w2, ((0, 0), (0, pad)))
        self.w1, self.b1, self.w2 = w1, b1, w2
        self.b2 = jnp.asarray(fc2_b, jnp.float32).reshape(1, 1)
        self._tile_b = int(tile_b) if tile_b else None

    def __call__(self, x):
        if x.ndim != 2 or x.shape[1] != self.hidden:
            raise ValueError(f"expected (B, {self.hidden}) input, got {x.shape}")
        tile_b = self._tile_b or _choose_tile_b(
            x.shape[0], self.hidden, self.tile_h, x.dtype.itemsize,
            self.compute_dtype.itemsize, self.vmem_budget)
        tile_b = max(16, (tile_b // 16) * 16)
        return _adversarial_forward(x, self.w1, self.b1, self.w2, self.b2,
                                    tile_b=tile_b, tile_h=self.tile_h,
                                    vmem_budget=self.vmem_budget)


def reference_forward(x, fc1_w, fc1_b, fc2_w, fc2_b):
    h = jnp.maximum(x @ fc1_w.T + fc1_b[None, :], 0.0)
    y = h @ fc2_w.T + fc2_b[None, :]
    return 1.0 / (1.0 + jnp.exp(-y))


def init_params(key, hidden):
    """Deterministic init mimicking nn.Linear defaults (uniform +-1/sqrt(fan_in))."""
    k1, k2, k3, k4 = jax.random.split(key, 4)
    bound = 1.0 / float(hidden) ** 0.5
    fc1_w = jax.random.uniform(k1, (hidden, hidden), jnp.float32, -bound, bound)
    fc1_b = jax.random.uniform(k2, (hidden,), jnp.float32, -bound, bound)
    fc2_w = jax.random.uniform(k3, (1, hidden), jnp.float32, -bound, bound)
    fc2_b = jax.random.uniform(k4, (1,), jnp.float32, -bound, bound)
    return fc1_w, fc1_b, fc2_w, fc2_b


if __name__ == "__main__":
    # Small shapes consistent with the module's (B, hidden) input.  B=500 is not
    # a tile multiple (exercises batch padding) and yields a 2-step "parallel"
    # batch grid; the third case forces the h-tiled (output-dim) path.
    H, B = 256, 500
    key = jax.random.PRNGKey(0)
    kx, kp, kx2, kp2 = jax.random.split(key, 4)
    x = jax.random.normal(kx, (B, H), jnp.float32)
    fc1_w, fc1_b, fc2_w, fc2_b = init_params(kp, H)

    # 1) exact-f32 path: matches the torch module's f32 semantics.
    model_f32 = AdversarialPallas(fc1_w, fc1_b, fc2_w, fc2_b,
                                  compute_dtype=jnp.float32)
    out = jax.block_until_ready(model_f32(x))
    ref = reference_forward(x, fc1_w, fc1_b, fc2_w, fc2_b)
    assert out.shape == (B, 1), out.shape
    err = float(jnp.max(jnp.abs(out - ref)))
    assert err < 5e-4, f"f32 path mismatch: {err}"

    # 2) default bf16-operand path (fc1 operands bf16, f32 accumulation).
    model_bf16 = AdversarialPallas(fc1_w, fc1_b, fc2_w, fc2_b)
    out_bf = jax.block_until_ready(model_bf16(x))
    ref_bf = reference_forward(x.astype(jnp.bfloat16).astype(jnp.float32),
                               fc1_w.astype(jnp.bfloat16).astype(jnp.float32),
                               fc1_b, fc2_w, fc2_b)
    err_bf = float(jnp.max(jnp.abs(out_bf - ref_bf)))
    assert err_bf < 2e-2, f"bf16 path mismatch: {err_bf}"

    # 3) h-tiled path (forced tile_h=128 < H=320): exercises the second
    #    "arbitrary" grid axis, the y accumulator scratch, and the fc1
    #    output-dim zero-padding (320 -> 384).
    H2, B2 = 320, 272
    x2 = jax.random.normal(kx2, (B2, H2), jnp.float32)
    p2 = init_params(kp2, H2)
    model_tiled = AdversarialPallas(*p2, compute_dtype=jnp.float32, tile_h=128)
    out2 = jax.block_until_ready(model_tiled(x2))
    ref2 = reference_forward(x2, *p2)
    assert out2.shape == (B2, 1), out2.shape
    err2 = float(jnp.max(jnp.abs(out2 - ref2)))
    assert err2 < 5e-4, f"h-tiled path mismatch: {err2}"

    print("KERNEL_OK")
</pallas_src>

<mosaic_0001>
module attributes {stable_mosaic.version = 11 : i64} {
  func.func @_adversarial_kernel(%arg0: i32, %arg1: i32, %arg2: memref<256x256xf32, #tpu.memory_space<vmem>>, %arg3: memref<256x256xf32, #tpu.memory_space<vmem>>, %arg4: memref<1x256xf32, #tpu.memory_space<vmem>>, %arg5: memref<1x256xf32, #tpu.memory_space<vmem>>, %arg6: memref<1x1xf32, #tpu.memory_space<smem>>, %arg7: memref<256x1xf32, #tpu.memory_space<vmem>>, %arg8: memref<256x1xf32, #tpu.memory_space<vmem>>) attributes {dimension_semantics = [#tpu.dimension_semantics<parallel>, #tpu.dimension_semantics<arbitrary>], iteration_bounds = array<i64: 2, 1>, scalar_prefetch = 0 : i64, scratch_operands = 1 : i64, tpu.core_type = #tpu.core_type<tc>, window_params = [{transform_indices = @transform_0, window_bounds = array<i64: 256, 256>}, {transform_indices = @transform_1, window_bounds = array<i64: 256, 256>}, {transform_indices = @transform_2, window_bounds = array<i64: 1, 256>}, {transform_indices = @transform_3, window_bounds = array<i64: 1, 256>}, {transform_indices = @transform_4, window_bounds = array<i64: 1, 1>}, {transform_indices = @transform_5, window_bounds = array<i64: 256, 1>}]} {
    %c0_i32 = arith.constant 0 : i32
    %0 = arith.cmpi eq, %arg1, %c0_i32 : i32
    %1 = arith.extui %0 : i1 to i32
    %c0_i32_0 = arith.constant 0 : i32
    %2 = arith.cmpi ne, %1, %c0_i32_0 : i32
    scf.if %2 {
      %cst_16 = arith.constant 0.000000e+00 : f32
      %22 = vector.broadcast %cst_16 : f32 to vector<256x1xf32>
      %c0_17 = arith.constant 0 : index
      %c0_18 = arith.constant 0 : index
      %23 = vector.load %arg8[%c0_17, %c0_18] : memref<256x1xf32, #tpu.memory_space<vmem>>, vector<256x1xf32>
      tpu.vector_store %arg8[%c0_17, %c0_18], %22 {strides = array<i32>} : memref<256x1xf32, #tpu.memory_space<vmem>>, vector<256x1xf32>,
    } else {
    }
    %c0 = arith.constant 0 : index
    %c0_1 = arith.constant 0 : index
    %3 = vector.load %arg2[%c0, %c0_1] : memref<256x256xf32, #tpu.memory_space<vmem>>, vector<256x256xf32>
    %c0_2 = arith.constant 0 : index
    %c0_3 = arith.constant 0 : index
    %4 = vector.load %arg3[%c0_2, %c0_3] : memref<256x256xf32, #tpu.memory_space<vmem>>, vector<256x256xf32>
    %cst = arith.constant dense<0.000000e+00> : vector<256x256xf32>
    %5 = tpu.matmul %3, %4, %cst {dimension_numbers = #tpu.dot_dimension_numbers<[1], [0], [0], [1], [0, 0, 1, 1], [], []>} : vector<256x256xf32>, vector<256x256xf32>, vector<256x256xf32> -> vector<256x256xf32>
    %c0_4 = arith.constant 0 : index
    %c0_5 = arith.constant 0 : index
    %6 = vector.load %arg4[%c0_4, %c0_5] : memref<1x256xf32, #tpu.memory_space<vmem>>, vector<1x256xf32>
    %7 = vector.broadcast %6 : vector<1x256xf32> to vector<256x256xf32>
    %8 = arith.addf %5, %7 : vector<256x256xf32>
    %cst_6 = arith.constant 0.000000e+00 : f32
    %9 = vector.broadcast %cst_6 : f32 to vector<256x256xf32>
    %10 = arith.maximumf %8, %9 : vector<256x256xf32>
    %c0_7 = arith.constant 0 : index
    %c0_8 = arith.constant 0 : index
    %11 = vector.load %arg8[%c0_7, %c0_8] : memref<256x1xf32, #tpu.memory_space<vmem>>, vector<256x1xf32>
    %c0_9 = arith.constant 0 : index
    %c0_10 = arith.constant 0 : index
    %12 = vector.load %arg5[%c0_9, %c0_10] : memref<1x256xf32, #tpu.memory_space<vmem>>, vector<1x256xf32>
    %13 = vector.broadcast %12 : vector<1x256xf32> to vector<256x256xf32>
    %14 = arith.mulf %10, %13 : vector<256x256xf32>
    %cst_11 = arith.constant dense<0.000000e+00> : vector<256xf32>
    %15 = vector.multi_reduction <add>, %14, %cst_11 [1] : vector<256x256xf32> to vector<256xf32>
    %16 = vector.shape_cast %15 : vector<256xf32> to vector<256x1xf32>
    %17 = arith.addf %11, %16 : vector<256x1xf32>
    %c0_12 = arith.constant 0 : index
    %c0_13 = arith.constant 0 : index
    %18 = vector.load %arg8[%c0_12, %c0_13] : memref<256x1xf32, #tpu.memory_space<vmem>>, vector<256x1xf32>
    tpu.vector_store %arg8[%c0_12, %c0_13], %17 {strides = array<i32>} : memref<256x1xf32, #tpu.memory_space<vmem>>, vector<256x1xf32>,
    %c0_i32_14 = arith.constant 0 : i32
    %19 = arith.cmpi eq, %arg1, %c0_i32_14 : i32
    %20 = arith.extui %19 : i1 to i32
    %c0_i32_15 = arith.constant 0 : i32
    %21 = arith.cmpi ne, %20, %c0_i32_15 : i32
    scf.if %21 {
      %c0_16 = arith.constant 0 : index
      %c0_17 = arith.constant 0 : index
      %22 = vector.load %arg8[%c0_16, %c0_17] : memref<256x1xf32, #tpu.memory_space<vmem>>, vector<256x1xf32>
      %c0_18 = arith.constant 0 : index
      %c0_19 = arith.constant 0 : index
      %23 = memref.load %arg6[%c0_18, %c0_19] : memref<1x1xf32, #tpu.memory_space<smem>>
      %24 = vector.broadcast %23 : f32 to vector<256x1xf32>
      %25 = arith.addf %22, %24 : vector<256x1xf32>
      %cst_20 = arith.constant 0.000000e+00 : f32
      %26 = vector.broadcast %cst_20 : f32 to vector<256x1xf32>
      %27 = arith.subf %26, %25 : vector<256x1xf32>
      %28 = math.exp %27 : vector<256x1xf32>
      %cst_21 = arith.constant 1.000000e+00 : f32
      %29 = vector.broadcast %cst_21 : f32 to vector<256x1xf32>
      %30 = arith.addf %29, %28 : vector<256x1xf32>
      %cst_22 = arith.constant 1.000000e+00 : f32
      %31 = vector.broadcast %cst_22 : f32 to vector<256x1xf32>
      %32 = arith.divf %31, %30 : vector<256x1xf32>
      %c0_23 = arith.constant 0 : index
      %c0_24 = arith.constant 0 : index
      %33 = vector.load %arg7[%c0_23, %c0_24] : memref<256x1xf32, #tpu.memory_space<vmem>>, vector<256x1xf32>
      tpu.vector_store %arg7[%c0_23, %c0_24], %32 {strides = array<i32>} : memref<256x1xf32, #tpu.memory_space<vmem>>, vector<256x1xf32>,
    } else {
    }
    return
  }
  func.func @transform_0(%arg0: i32, %arg1: i32) -> (i32, i32) {
    %c0_i32 = arith.constant 0 : i32
    %c0_i32_0 = arith.constant 0 : i32
    return %arg0, %c0_i32 : i32, i32
  }
  func.func @transform_1(%arg0: i32, %arg1: i32) -> (i32, i32) {
    %c0_i32 = arith.constant 0 : i32
    %c0_i32_0 = arith.constant 0 : i32
    return %c0_i32, %arg1 : i32, i32
  }
  func.func @transform_2(%arg0: i32, %arg1: i32) -> (i32, i32) {
    %c0_i32 = arith.constant 0 : i32
    %c0_i32_0 = arith.constant 0 : i32
    return %c0_i32, %arg1 : i32, i32
  }
  func.func @transform_3(%arg0: i32, %arg1: i32) -> (i32, i32) {
    %c0_i32 = arith.constant 0 : i32
    %c0_i32_0 = arith.constant 0 : i32
    return %c0_i32, %arg1 : i32, i32
  }
  func.func @transform_4(%arg0: i32, %arg1: i32) -> (i32, i32) {
    %c0_i32 = arith.constant 0 : i32
    %c0_i32_0 = arith.constant 0 : i32
    %c0_i32_1 = arith.constant 0 : i32
    return %c0_i32, %c0_i32_0 : i32, i32
  }
  func.func @transform_5(%arg0: i32, %arg1: i32) -> (i32, i32) {
    %c0_i32 = arith.constant 0 : i32
    %c0_i32_0 = arith.constant 0 : i32
    return %arg0, %c0_i32 : i32, i32
  }
}

</mosaic_0001>

<bundles_post_ra>
// kernel: _adversarial_forward.1
= control target key start
LH: loop header
LB: loop body
LE: loop exit
PB: predicated region body
PF: predicated region fallthrough
CT: control target
= control target key end

     0   :  { %s1759_s20 = smov 0   ;;  %s1761_s21 = smov 0   ;;  %s2363_s0 = inlined_call_operand.vmem [shape: f32[512,256], index: 0, kind: input, shape index: {}]   ;;  %s2364_s1 = inlined_call_operand.vmem [shape: f32[256,256], index: 1, kind: input, shape index: {}]   ;;  %s2365_s2 = inlined_call_operand.vmem [shape: f32[1,256], index: 2, kind: input, shape index: {}]   ;;  %s2366_s3 = inlined_call_operand.vmem [shape: f32[1,256], index: 3, kind: input, shape index: {}]   ;;  %s2367_s4 = inlined_call_operand.<no memory space> [shape: f32[1,1], index: 4, kind: input, shape index: {}]   ;;  %s2368_s5 = inlined_call_operand.vmem [shape: f32[512,1], index: 5, kind: output, shape index: {}]  }
   0x1   :  { %10 = sst [smem:[#allocation3]] %s2367_s4  ;;  %s1763_s22 = smov 0  }
   0x2 LB: > { %s28_s4 = sadd.s32 1, %s1719_s21  ;;  %p1475_p0 = scmp.ge.s32.totalorder %s1723_s22, 1  ;;  %s1723_s22 = sphi %s1763_s22, %s16_s22   ;;  %s1719_s21 = sphi %s1761_s21, %s2370_s21   ;;  %s1715_s20 = sphi %s1759_s20, %s2369_s20  }
   0x3   : > { %p30_p1 = scmp.ge.s32.totalorder %s28_s4, 2  ;;  %p233_p2 = scmp.lt.s32.totalorder %s1723_s22, 3 }
   0x5   : > { %s2372_s4 = smov (%p30_p1, %s28_s4), 0  ;;  %p234_p3 = pnand %p1475_p0, %p233_p2 }
   0x6   : > { %s1476_s6 = sshll.u32 (!%p234_p3), %s1715_s20, 5  ;;  %s1106_s27 = sld [smem:[#allocation3]] (!%p234_p3) }
   0x7   : > { %237 = sbr.rel (%p234_p3) target bundleno = 531 (0x213), region = 40  ;;  %p276_p4 = scmp.lt.s32.totalorder (!%p234_p3), %s1476_s6, 63 }
   0xc   : > { %v436_v0 = vld [vmem:[%s2364_s1 + $0xf8] sm:$0xff]  ;;  %v435_v1 = vld [vmem:[%s2364_s1 + $0xf0] sm:$0xff]  ;;  %v434_v2 = vld [vmem:[%s2364_s1 + $0xe8] sm:$0xff]  ;;  %s2374_s6 = smov (!%p276_p4, %s1476_s6), 63  ;;  %vm308_vm0 = vcmask 7168  }
   0xd   : > { %481 = vmatprep.subr.mxu0 %v436_v0  ;;  %1484 = vmatprep.subr.mxu1 %v436_v0  ;;  %v433_v3 = vld [vmem:[%s2364_s1 + $0xe0] sm:$0xff]  ;;  %v432_v4 = vld [vmem:[%s2364_s1 + $0xd8] sm:$0xff]  ;;  %v431_v5 = vld [vmem:[%s2364_s1 + $0xd0] sm:$0xff]  ;;  %s1483_s7 = sshll.u32 %s2374_s6, 4  ;;  %s1480_s28 = sshll.u32 %s2374_s6, 3 }
   0xe   : > { %482 = vmatpush1.msra.mxu0 %v435_v1  ;;  %1516 = vmatpush1.msra.mxu1 %v435_v1  ;;  %v430_v6 = vld [vmem:[%s2364_s1 + $0xc8] sm:$0xff]  ;;  %v429_v7 = vld [vmem:[%s2364_s1 + $0xc0] sm:$0xff]  ;;  %v428_v8 = vld [vmem:[%s2364_s1 + $0xb8] sm:$0xff]  ;;  %s1972_s15 = scalar_lea.vmem %s2363_s0, %s1483_s7  ;;  %s2261_s30 = scalar_lea.vmem %s2368_s5, %s1480_s28 }
   0xf   : > { %483 = vmatprep.subr.mxu0 %v434_v2  ;;  %1485 = vmatprep.subr.mxu1 %v434_v2  ;;  %v427_v9 = vld [vmem:[%s2364_s1 + $0xb0] sm:$0xff]  ;;  %v426_v10 = vld [vmem:[%s2364_s1 + $0xa8] sm:$0xff]  ;;  %v425_v11 = vld [vmem:[%s2364_s1 + $0xa0] sm:$0xff] }
  0x10   : > { %484 = vmatpush1.msra.mxu0 %v433_v3  ;;  %1517 = vmatpush1.msra.mxu1 %v433_v3  ;;  %v424_v12 = vld [vmem:[%s2364_s1 + $0x98] sm:$0xff]  ;;  %v423_v13 = vld [vmem:[%s2364_s1 + $0x90] sm:$0xff]  ;;  %v422_v14 = vld [vmem:[%s2364_s1 + $0x88] sm:$0xff] }
  0x11   : > { %485 = vmatprep.subr.mxu0 %v432_v4  ;;  %1486 = vmatprep.subr.mxu1 %v432_v4  ;;  %v421_v15 = vld [vmem:[%s2364_s1 + $0x80] sm:$0xff]  ;;  %v420_v16 = vld [vmem:[%s2364_s1 + $0x78] sm:$0xff]  ;;  %v419_v17 = vld [vmem:[%s2364_s1 + $0x70] sm:$0xff] }
  0x12   : > { %486 = vmatpush1.msra.mxu0 %v431_v5  ;;  %1518 = vmatpush1.msra.mxu1 %v431_v5  ;;  %v418_v18 = vld [vmem:[%s2364_s1 + $0x68] sm:$0xff]  ;;  %v417_v19 = vld [vmem:[%s2364_s1 + $0x60] sm:$0xff]  ;;  %v416_v20 = vld [vmem:[%s2364_s1 + $0x58] sm:$0xff] }
  0x13   : > { %487 = vmatprep.subr.mxu0 %v430_v6  ;;  %1487 = vmatprep.subr.mxu1 %v430_v6  ;;  %v415_v21 = vld [vmem:[%s2364_s1 + $0x50] sm:$0xff]  ;;  %v414_v22 = vld [vmem:[%s2364_s1 + $0x48] sm:$0xff]  ;;  %v413_v23 = vld [vmem:[%s2364_s1 + $0x40] sm:$0xff] }
  0x14   : > { %488 = vmatpush1.msra.mxu0 %v429_v7  ;;  %1519 = vmatpush1.msra.mxu1 %v429_v7  ;;  %v412_v24 = vld [vmem:[%s2364_s1 + $0x38] sm:$0xff]  ;;  %v411_v25 = vld [vmem:[%s2364_s1 + $0x30] sm:$0xff]  ;;  %v410_v26 = vld [vmem:[%s2364_s1 + $0x28] sm:$0xff] }
  0x15   : > { %489 = vmatprep.subr.mxu0 %v428_v8  ;;  %1488 = vmatprep.subr.mxu1 %v428_v8  ;;  %v409_v27 = vld [vmem:[%s2364_s1 + $0x20] sm:$0xff]  ;;  %v408_v28 = vld [vmem:[%s2364_s1 + $0x18] sm:$0xff]  ;;  %v407_v29 = vld [vmem:[%s2364_s1 + $0x10] sm:$0xff] }
  0x16   : > { %490 = vmatpush1.msra.mxu0 %v427_v9  ;;  %1520 = vmatpush1.msra.mxu1 %v427_v9  ;;  %v406_v30 = vld [vmem:[%s2364_s1 + $0x8] sm:$0xff]  ;;  %v405_v31 = vld [vmem:[%s2364_s1] sm:$0xff]  ;;  %v468_v32 = vld [vmem:[%s2364_s1 + $0x1f8] sm:$0xff] }
  0x17   : > { %491 = vmatprep.subr.mxu0 %v426_v10  ;;  %1489 = vmatprep.subr.mxu1 %v426_v10  ;;  %v467_v33 = vld [vmem:[%s2364_s1 + $0x1f0] sm:$0xff]  ;;  %v466_v34 = vld [vmem:[%s2364_s1 + $0x1e8] sm:$0xff]  ;;  %v465_v35 = vld [vmem:[%s2364_s1 + $0x1e0] sm:$0xff] }
  0x18   : > { %492 = vmatpush1.msra.mxu0 %v425_v11  ;;  %1521 = vmatpush1.msra.mxu1 %v425_v11  ;;  %v464_v36 = vld [vmem:[%s2364_s1 + $0x1d8] sm:$0xff]  ;;  %v463_v37 = vld [vmem:[%s2364_s1 + $0x1d0] sm:$0xff]  ;;  %v462_v38 = vld [vmem:[%s2364_s1 + $0x1c8] sm:$0xff] }
  0x19   : > { %493 = vmatprep.subr.mxu0 %v424_v12  ;;  %1490 = vmatprep.subr.mxu1 %v424_v12  ;;  %v461_v39 = vld [vmem:[%s2364_s1 + $0x1c0] sm:$0xff]  ;;  %v460_v40 = vld [vmem:[%s2364_s1 + $0x1b8] sm:$0xff]  ;;  %v459_v41 = vld [vmem:[%s2364_s1 + $0x1b0] sm:$0xff] }
  0x1a   : > { %494 = vmatpush1.msra.mxu0 %v423_v13  ;;  %1522 = vmatpush1.msra.mxu1 %v423_v13  ;;  %v458_v42 = vld [vmem:[%s2364_s1 + $0x1a8] sm:$0xff]  ;;  %v457_v43 = vld [vmem:[%s2364_s1 + $0x1a0] sm:$0xff]  ;;  %v456_v44 = vld [vmem:[%s2364_s1 + $0x198] sm:$0xff] }
  0x1b   : > { %495 = vmatprep.subr.mxu0 %v422_v14  ;;  %1491 = vmatprep.subr.mxu1 %v422_v14  ;;  %v455_v45 = vld [vmem:[%s2364_s1 + $0x190] sm:$0xff]  ;;  %v454_v46 = vld [vmem:[%s2364_s1 + $0x188] sm:$0xff]  ;;  %v453_v47 = vld [vmem:[%s2364_s1 + $0x180] sm:$0xff] }
  0x1c   : > { %496 = vmatpush1.msra.mxu0 %v421_v15  ;;  %1523 = vmatpush1.msra.mxu1 %v421_v15  ;;  %v452_v48 = vld [vmem:[%s2364_s1 + $0x178] sm:$0xff]  ;;  %v451_v49 = vld [vmem:[%s2364_s1 + $0x170] sm:$0xff]  ;;  %v450_v50 = vld [vmem:[%s2364_s1 + $0x168] sm:$0xff] }
  0x1d   : > { %497 = vmatprep.subr.mxu0 %v420_v16  ;;  %1492 = vmatprep.subr.mxu1 %v420_v16  ;;  %v449_v51 = vld [vmem:[%s2364_s1 + $0x160] sm:$0xff]  ;;  %v448_v52 = vld [vmem:[%s2364_s1 + $0x158] sm:$0xff]  ;;  %v447_v53 = vld [vmem:[%s2364_s1 + $0x150] sm:$0xff] }
  0x1e   : > { %498 = vmatpush1.msra.mxu0 %v419_v17  ;;  %1524 = vmatpush1.msra.mxu1 %v419_v17  ;;  %v446_v54 = vld [vmem:[%s2364_s1 + $0x148] sm:$0xff]  ;;  %v445_v55 = vld [vmem:[%s2364_s1 + $0x140] sm:$0xff]  ;;  %v444_v56 = vld [vmem:[%s2364_s1 + $0x138] sm:$0xff] }
  0x1f   : > { %499 = vmatprep.subr.mxu0 %v418_v18  ;;  %1493 = vmatprep.subr.mxu1 %v418_v18  ;;  %v443_v57 = vld [vmem:[%s2364_s1 + $0x130] sm:$0xff]  ;;  %v442_v58 = vld [vmem:[%s2364_s1 + $0x128] sm:$0xff]  ;;  %v441_v59 = vld [vmem:[%s2364_s1 + $0x120] sm:$0xff] }
  0x20   : > { %500 = vmatpush1.msra.mxu0 %v417_v19  ;;  %1525 = vmatpush1.msra.mxu1 %v417_v19  ;;  %v440_v60 = vld [vmem:[%s2364_s1 + $0x118] sm:$0xff]  ;;  %v439_v61 = vld [vmem:[%s2364_s1 + $0x110] sm:$0xff]  ;;  %v438_v62 = vld [vmem:[%s2364_s1 + $0x108] sm:$0xff] }
  0x21   : > { %501 = vmatprep.subr.mxu0 %v416_v20  ;;  %1494 = vmatprep.subr.mxu1 %v416_v20  ;;  %v437_v63 = vld [vmem:[%s2364_s1 + $0x100] sm:$0xff]  ;;  %v342_v0 = vld [vmem:[%s1972_s15 + $0x8] sm:$0xff]  ;;  %v344_v4 = vld [vmem:[%s1972_s15 + $0x18] sm:$0xff] }
  0x22   : > { %502 = vmatpush1.msra.mxu0 %v415_v21  ;;  %1526 = vmatpush1.msra.mxu1 %v415_v21  ;;  %v374_v1 = vld [vmem:[%s1972_s15 + $0x108] sm:$0xff]  ;;  %v341_v2 = vld [vmem:[%s1972_s15] sm:$0xff]  ;;  %v376_v5 = vld [vmem:[%s1972_s15 + $0x118] sm:$0xff] }
  0x23   : > { %503 = vmatprep.subr.mxu0 %v414_v22  ;;  %1495 = vmatprep.subr.mxu1 %v414_v22  ;;  %v373_v3 = vld [vmem:[%s1972_s15 + $0x100] sm:$0xff]  ;;  %v343_v6 = vld [vmem:[%s1972_s15 + $0x10] sm:$0xff]  ;;  %v346_v8 = vld [vmem:[%s1972_s15 + $0x28] sm:$0xff] }
  0x24   : > { %504 = vmatpush1.msra.mxu0 %v413_v23  ;;  %1527 = vmatpush1.msra.mxu1 %v413_v23  ;;  %v375_v7 = vld [vmem:[%s1972_s15 + $0x110] sm:$0xff]  ;;  %v378_v9 = vld [vmem:[%s1972_s15 + $0x128] sm:$0xff]  ;;  %v345_v10 = vld [vmem:[%s1972_s15 + $0x20] sm:$0xff] }
  0x25   : > { %505 = vmatprep.subr.mxu0 %v412_v24  ;;  %1496 = vmatprep.subr.mxu1 %v412_v24  ;;  %v377_v11 = vld [vmem:[%s1972_s15 + $0x120] sm:$0xff]  ;;  %v348_v12 = vld [vmem:[%s1972_s15 + $0x38] sm:$0xff]  ;;  %v347_v14 = vld [vmem:[%s1972_s15 + $0x30] sm:$0xff] }
  0x26   : > { %506 = vmatpush1.msra.mxu0 %v411_v25  ;;  %1528 = vmatpush1.msra.mxu1 %v411_v25  ;;  %v380_v13 = vld [vmem:[%s1972_s15 + $0x138] sm:$0xff]  ;;  %v379_v15 = vld [vmem:[%s1972_s15 + $0x130] sm:$0xff]  ;;  %v350_v16 = vld [vmem:[%s1972_s15 + $0x48] sm:$0xff] }
  0x27   : > { %507 = vmatprep.subr.mxu0 %v410_v26  ;;  %1497 = vmatprep.subr.mxu1 %v410_v26  ;;  %v382_v17 = vld [vmem:[%s1972_s15 + $0x148] sm:$0xff]  ;;  %v349_v18 = vld [vmem:[%s1972_s15 + $0x40] sm:$0xff]  ;;  %v352_v20 = vld [vmem:[%s1972_s15 + $0x58] sm:$0xff] }
  0x28   : > { %508 = vmatpush1.msra.mxu0 %v409_v27  ;;  %1529 = vmatpush1.msra.mxu1 %v409_v27  ;;  %v381_v19 = vld [vmem:[%s1972_s15 + $0x140] sm:$0xff]  ;;  %v384_v21 = vld [vmem:[%s1972_s15 + $0x158] sm:$0xff]  ;;  %v351_v22 = vld [vmem:[%s1972_s15 + $0x50] sm:$0xff] }
  0x29   : > { %509 = vmatprep.subr.mxu0 %v408_v28  ;;  %1498 = vmatprep.subr.mxu1 %v408_v28  ;;  %v383_v23 = vld [vmem:[%s1972_s15 + $0x150] sm:$0xff]  ;;  %v354_v24 = vld [vmem:[%s1972_s15 + $0x68] sm:$0xff]  ;;  %v353_v26 = vld [vmem:[%s1972_s15 + $0x60] sm:$0xff] }
  0x2a   : > { %510 = vmatpush1.msra.mxu0 %v407_v29  ;;  %1530 = vmatpush1.msra.mxu1 %v407_v29  ;;  %v386_v25 = vld [vmem:[%s1972_s15 + $0x168] sm:$0xff]  ;;  %v385_v27 = vld [vmem:[%s1972_s15 + $0x160] sm:$0xff]  ;;  %v356_v28 = vld [vmem:[%s1972_s15 + $0x78] sm:$0xff] }
  0x2b   : > { %511 = vmatprep.subr.mxu0 %v406_v30  ;;  %1499 = vmatprep.subr.mxu1 %v406_v30  ;;  %v388_v29 = vld [vmem:[%s1972_s15 + $0x178] sm:$0xff]  ;;  %v355_v30 = vld [vmem:[%s1972_s15 + $0x70] sm:$0xff] }
  0x2c   : > { %512 = vmatpush1.msra.mxu0 %v405_v31  ;;  %1531 = vmatpush1.msra.mxu1 %v405_v31  ;;  %v387_v31 = vld [vmem:[%s1972_s15 + $0x170] sm:$0xff] }
  0x2d   : > { %513 = vmatprep.subr.mxu0 %v468_v32  ;;  %1500 = vmatprep.subr.mxu1 %v468_v32  ;;  %v358_v32 = vld [vmem:[%s1972_s15 + $0x88] sm:$0xff] }
  0x2e   : > { %514 = vmatpush2.msra.mxu0 %v467_v33  ;;  %1532 = vmatpush2.msra.mxu1 %v467_v33  ;;  %v390_v33 = vld [vmem:[%s1972_s15 + $0x188] sm:$0xff] }
  0x2f   : > { %515 = vmatprep.subr.mxu0 %v466_v34  ;;  %1501 = vmatprep.subr.mxu1 %v466_v34  ;;  %v357_v34 = vld [vmem:[%s1972_s15 + $0x80] sm:$0xff] }
  0x30   : > { %516 = vmatpush2.msra.mxu0 %v465_v35  ;;  %1533 = vmatpush2.msra.mxu1 %v465_v35  ;;  %v389_v35 = vld [vmem:[%s1972_s15 + $0x180] sm:$0xff] }
  0x31   : > { %517 = vmatprep.subr.mxu0 %v464_v36  ;;  %1502 = vmatprep.subr.mxu1 %v464_v36  ;;  %v360_v36 = vld [vmem:[%s1972_s15 + $0x98] sm:$0xff] }
  0x32   : > { %518 = vmatpush2.msra.mxu0 %v463_v37  ;;  %1534 = vmatpush2.msra.mxu1 %v463_v37  ;;  %v392_v37 = vld [vmem:[%s1972_s15 + $0x198] sm:$0xff] }
  0x33   : > { %519 = vmatprep.subr.mxu0 %v462_v38  ;;  %1503 = vmatprep.subr.mxu1 %v462_v38  ;;  %v359_v38 = vld [vmem:[%s1972_s15 + $0x90] sm:$0xff] }
  0x34   : > { %520 = vmatpush2.msra.mxu0 %v461_v39  ;;  %1535 = vmatpush2.msra.mxu1 %v461_v39  ;;  %v391_v39 = vld [vmem:[%s1972_s15 + $0x190] sm:$0xff] }
  0x35   : > { %521 = vmatprep.subr.mxu0 %v460_v40  ;;  %1504 = vmatprep.subr.mxu1 %v460_v40  ;;  %v362_v40 = vld [vmem:[%s1972_s15 + $0xa8] sm:$0xff] }
  0x36   : > { %522 = vmatpush2.msra.mxu0 %v459_v41  ;;  %1536 = vmatpush2.msra.mxu1 %v459_v41  ;;  %v394_v41 = vld [vmem:[%s1972_s15 + $0x1a8] sm:$0xff] }
  0x37   : > { %523 = vmatprep.subr.mxu0 %v458_v42  ;;  %1505 = vmatprep.subr.mxu1 %v458_v42  ;;  %v361_v42 = vld [vmem:[%s1972_s15 + $0xa0] sm:$0xff] }
  0x38   : > { %524 = vmatpush2.msra.mxu0 %v457_v43  ;;  %1537 = vmatpush2.msra.mxu1 %v457_v43  ;;  %v393_v43 = vld [vmem:[%s1972_s15 + $0x1a0] sm:$0xff] }
  0x39   : > { %525 = vmatprep.subr.mxu0 %v456_v44  ;;  %1506 = vmatprep.subr.mxu1 %v456_v44  ;;  %v364_v44 = vld [vmem:[%s1972_s15 + $0xb8] sm:$0xff] }
  0x3a   : > { %526 = vmatpush2.msra.mxu0 %v455_v45  ;;  %1538 = vmatpush2.msra.mxu1 %v455_v45  ;;  %v396_v45 = vld [vmem:[%s1972_s15 + $0x1b8] sm:$0xff] }
  0x3b   : > { %527 = vmatprep.subr.mxu0 %v454_v46  ;;  %1507 = vmatprep.subr.mxu1 %v454_v46  ;;  %v363_v46 = vld [vmem:[%s1972_s15 + $0xb0] sm:$0xff] }
  0x3c   : > { %528 = vmatpush2.msra.mxu0 %v453_v47  ;;  %1539 = vmatpush2.msra.mxu1 %v453_v47  ;;  %v395_v47 = vld [vmem:[%s1972_s15 + $0x1b0] sm:$0xff] }
  0x3d   : > { %529 = vmatprep.subr.mxu0 %v452_v48  ;;  %1508 = vmatprep.subr.mxu1 %v452_v48  ;;  %v366_v48 = vld [vmem:[%s1972_s15 + $0xc8] sm:$0xff] }
  0x3e   : > { %530 = vmatpush2.msra.mxu0 %v451_v49  ;;  %1540 = vmatpush2.msra.mxu1 %v451_v49  ;;  %v398_v49 = vld [vmem:[%s1972_s15 + $0x1c8] sm:$0xff] }
  0x3f   : > { %531 = vmatprep.subr.mxu0 %v450_v50  ;;  %1509 = vmatprep.subr.mxu1 %v450_v50  ;;  %v365_v50 = vld [vmem:[%s1972_s15 + $0xc0] sm:$0xff] }
  0x40   : > { %532 = vmatpush2.msra.mxu0 %v449_v51  ;;  %1541 = vmatpush2.msra.mxu1 %v449_v51  ;;  %v397_v51 = vld [vmem:[%s1972_s15 + $0x1c0] sm:$0xff] }
  0x41   : > { %533 = vmatprep.subr.mxu0 %v448_v52  ;;  %1510 = vmatprep.subr.mxu1 %v448_v52  ;;  %v368_v52 = vld [vmem:[%s1972_s15 + $0xd8] sm:$0xff] }
  0x42   : > { %534 = vmatpush2.msra.mxu0 %v447_v53  ;;  %1542 = vmatpush2.msra.mxu1 %v447_v53  ;;  %v400_v53 = vld [vmem:[%s1972_s15 + $0x1d8] sm:$0xff] }
  0x43   : > { %535 = vmatprep.subr.mxu0 %v446_v54  ;;  %1511 = vmatprep.subr.mxu1 %v446_v54  ;;  %v367_v54 = vld [vmem:[%s1972_s15 + $0xd0] sm:$0xff] }
  0x44   : > { %536 = vmatpush2.msra.mxu0 %v445_v55  ;;  %1543 = vmatpush2.msra.mxu1 %v445_v55  ;;  %v399_v55 = vld [vmem:[%s1972_s15 + $0x1d0] sm:$0xff] }
  0x45   : > { %537 = vmatprep.subr.mxu0 %v444_v56  ;;  %1512 = vmatprep.subr.mxu1 %v444_v56  ;;  %v370_v56 = vld [vmem:[%s1972_s15 + $0xe8] sm:$0xff] }
  0x46   : > { %538 = vmatpush2.msra.mxu0 %v443_v57  ;;  %1544 = vmatpush2.msra.mxu1 %v443_v57  ;;  %v402_v57 = vld [vmem:[%s1972_s15 + $0x1e8] sm:$0xff] }
  0x47   : > { %539 = vmatprep.subr.mxu0 %v442_v58  ;;  %1513 = vmatprep.subr.mxu1 %v442_v58  ;;  %v369_v58 = vld [vmem:[%s1972_s15 + $0xe0] sm:$0xff] }
  0x48   : > { %540 = vmatpush2.msra.mxu0 %v441_v59  ;;  %1545 = vmatpush2.msra.mxu1 %v441_v59  ;;  %v401_v59 = vld [vmem:[%s1972_s15 + $0x1e0] sm:$0xff] }
  0x49   : > { %541 = vmatprep.subr.mxu0 %v440_v60  ;;  %1514 = vmatprep.subr.mxu1 %v440_v60  ;;  %v372_v60 = vld [vmem:[%s1972_s15 + $0xf8] sm:$0xff] }
  0x4a   : > { %542 = vmatpush2.msra.mxu0 %v439_v61  ;;  %1546 = vmatpush2.msra.mxu1 %v439_v61  ;;  %v404_v61 = vld [vmem:[%s1972_s15 + $0x1f8] sm:$0xff] }
  0x4b   : > { %543 = vmatprep.subr.mxu0 %v438_v62  ;;  %1515 = vmatprep.subr.mxu1 %v438_v62  ;;  %v371_v62 = vld [vmem:[%s1972_s15 + $0xf0] sm:$0xff] }
  0x4c   : > { %544 = vmatpush2.msra.mxu0 %v437_v63  ;;  %1547 = vmatpush2.msra.mxu1 %v437_v63  ;;  %v403_v63 = vld [vmem:[%s1972_s15 + $0x1f0] sm:$0xff] }
  0x4d   : > { %545 = vmatprep.mubr.f32.mxu0 %v342_v0  ;;  %641 = vmatprep.mubr.f32.mxu1 %v374_v1  ;;  %v1725_v0 = vmov 0.0   ;;  %v471_v1 = vlaneseq }
  0x4e   : > { %546 = vmatmul.mubr.f32.vlgmr.msra.gmra.mxu0 %v341_v2  ;;  %642 = vmatmul.mubr.f32.vlgmr.msra.gmra.mxu1 %v373_v3  ;;  %309 = vst.msk [vmem:[#allocation2] sm:$0xff] %vm308_vm0, %v1725_v0  ;;  %310 = vst.msk [vmem:[#allocation2 + $0x8] sm:$0xff] %vm308_vm0, %v1725_v0 }
  0x4f   : > { %551 = vmatprep.mubr.f32.mxu0 %v344_v4  ;;  %647 = vmatprep.mubr.f32.mxu1 %v376_v5  ;;  %311 = vst.msk [vmem:[#allocation2 + $0x10] sm:$0xff] %vm308_vm0, %v1725_v0  ;;  %312 = vst.msk [vmem:[#allocation2 + $0x18] sm:$0xff] %vm308_vm0, %v1725_v0  ;;  %v472_v2 = vshrl.u32 %v471_v1, 7  ;;  %v469_v4 = vld [vmem:[%s2365_s2] sm:$0x3] }
  0x50   : > { %313 = vst.msk [vmem:[#allocation2 + $0x20] sm:$0xff] %vm308_vm0, %v1725_v0  ;;  %314 = vst.msk [vmem:[#allocation2 + $0x28] sm:$0xff] %vm308_vm0, %v1725_v0 }
  0x51   : > { %315 = vst.msk [vmem:[#allocation2 + $0x30] sm:$0xff] %vm308_vm0, %v1725_v0  ;;  %316 = vst.msk [vmem:[#allocation2 + $0x38] sm:$0xff] %vm308_vm0, %v1725_v0  ;;  %v473_v3 = vsub.s32 0, %v472_v2  ;;  %v477_v5 = vsub.s32 1, %v472_v2 }
  0x52   : > { %552 = vmatmul.mubr.f32.gmra.mxu0 %v343_v6  ;;  %648 = vmatmul.mubr.f32.gmra.mxu1 %v375_v7  ;;  %317 = vst.msk [vmem:[#allocation2 + $0x40] sm:$0xff] %vm308_vm0, %v1725_v0  ;;  %318 = vst.msk [vmem:[#allocation2 + $0x48] sm:$0xff] %vm308_vm0, %v1725_v0 }
  0x53   : > { %557 = vmatprep.mubr.f32.mxu0 %v346_v8  ;;  %653 = vmatprep.mubr.f32.mxu1 %v378_v9  ;;  %319 = vst.msk [vmem:[#allocation2 + $0x50] sm:$0xff] %vm308_vm0, %v1725_v0  ;;  %320 = vst.msk [vmem:[#allocation2 + $0x58] sm:$0xff] %vm308_vm0, %v1725_v0  ;;  %v2079_v6 = vrot.slane %v469_v4, %v473_v3  ;;  %v2081_v7 = vrot.slane %v469_v4, %v477_v5 }
  0x54   : > { %321 = vst.msk [vmem:[#allocation2 + $0x60] sm:$0xff] %vm308_vm0, %v1725_v0  ;;  %322 = vst.msk [vmem:[#allocation2 + $0x68] sm:$0xff] %vm308_vm0, %v1725_v0 }
  0x55   : > { %323 = vst.msk [vmem:[#allocation2 + $0x70] sm:$0xff] %vm308_vm0, %v1725_v0  ;;  %324 = vst.msk [vmem:[#allocation2 + $0x78] sm:$0xff] %vm308_vm0, %v1725_v0 }
  0x56   : > { %558 = vmatmul.mubr.f32.gmra.mxu0 %v345_v10  ;;  %654 = vmatmul.mubr.f32.gmra.mxu1 %v377_v11  ;;  %325 = vst.msk [vmem:[#allocation2 + $0x80] sm:$0xff] %vm308_vm0, %v1725_v0  ;;  %326 = vst.msk [vmem:[#allocation2 + $0x88] sm:$0xff] %vm308_vm0, %v1725_v0  ;;  %v834_v11 = vld [vmem:[%s2366_s3] sm:$0x3] }
  0x57   : > { %563 = vmatprep.mubr.f32.mxu0 %v348_v12  ;;  %659 = vmatprep.mubr.f32.mxu1 %v380_v13  ;;  %327 = vst.msk [vmem:[#allocation2 + $0x90] sm:$0xff] %vm308_vm0, %v1725_v0  ;;  %328 = vst.msk [vmem:[#allocation2 + $0x98] sm:$0xff] %vm308_vm0, %v1725_v0 }
  0x58   : > { %329 = vst.msk [vmem:[#allocation2 + $0xa0] sm:$0xff] %vm308_vm0, %v1725_v0  ;;  %330 = vst.msk [vmem:[#allocation2 + $0xa8] sm:$0xff] %vm308_vm0, %v1725_v0 }
  0x59   : > { %331 = vst.msk [vmem:[#allocation2 + $0xb0] sm:$0xff] %vm308_vm0, %v1725_v0  ;;  %332 = vst.msk [vmem:[#allocation2 + $0xb8] sm:$0xff] %vm308_vm0, %v1725_v0 }
  0x5a   : > { %564 = vmatmul.mubr.f32.gmra.mxu0 %v347_v14  ;;  %660 = vmatmul.mubr.f32.gmra.mxu1 %v379_v15  ;;  %333 = vst.msk [vmem:[#allocation2 + $0xc0] sm:$0xff] %vm308_vm0, %v1725_v0  ;;  %334 = vst.msk [vmem:[#allocation2 + $0xc8] sm:$0xff] %vm308_vm0, %v1725_v0 }
  0x5b   : > { %569 = vmatprep.mubr.f32.mxu0 %v350_v16  ;;  %665 = vmatprep.mubr.f32.mxu1 %v382_v17  ;;  %335 = vst.msk [vmem:[#allocation2 + $0xd0] sm:$0xff] %vm308_vm0, %v1725_v0  ;;  %336 = vst.msk [vmem:[#allocation2 + $0xd8] sm:$0xff] %vm308_vm0, %v1725_v0 }
  0x5c   : > { %337 = vst.msk [vmem:[#allocation2 + $0xe0] sm:$0xff] %vm308_vm0, %v1725_v0  ;;  %338 = vst.msk [vmem:[#allocation2 + $0xe8] sm:$0xff] %vm308_vm0, %v1725_v0 }
  0x5d   : > { %339 = vst.msk [vmem:[#allocation2 + $0xf0] sm:$0xff] %vm308_vm0, %v1725_v0  ;;  %340 = vst.msk [vmem:[#allocation2 + $0xf8] sm:$0xff] %vm308_vm0, %v1725_v0 }
  0x5e   : > { %570 = vmatmul.mubr.f32.gmra.mxu0 %v349_v18  ;;  %666 = vmatmul.mubr.f32.gmra.mxu1 %v381_v19  ;;  %v2090_v18 = vrot.slane %v834_v11, %v473_v3  ;;  %v2092_v19 = vrot.slane %v834_v11, %v477_v5 }
  0x5f   : > { %575 = vmatprep.mubr.f32.mxu0 %v352_v20  ;;  %671 = vmatprep.mubr.f32.mxu1 %v384_v21 }
  0x62   : > { %576 = vmatmul.mubr.f32.gmra.mxu0 %v351_v22  ;;  %672 = vmatmul.mubr.f32.gmra.mxu1 %v383_v23 }
  0x63   : > { %581 = vmatprep.mubr.f32.mxu0 %v354_v24  ;;  %677 = vmatprep.mubr.f32.mxu1 %v386_v25 }
  0x66   : > { %582 = vmatmul.mubr.f32.gmra.mxu0 %v353_v26  ;;  %678 = vmatmul.mubr.f32.gmra.mxu1 %v385_v27 }
  0x67   : > { %587 = vmatprep.mubr.f32.mxu0 %v356_v28  ;;  %683 = vmatprep.mubr.f32.mxu1 %v388_v29 }
  0x6a   : > { %588 = vmatmul.mubr.f32.gmra.mxu0 %v355_v30  ;;  %684 = vmatmul.mubr.f32.gmra.mxu1 %v387_v31 }
  0x6b   : > { %593 = vmatprep.mubr.f32.mxu0 %v358_v32  ;;  %689 = vmatprep.mubr.f32.mxu1 %v390_v33 }
  0x6e   : > { %594 = vmatmul.mubr.f32.gmra.mxu0 %v357_v34  ;;  %690 = vmatmul.mubr.f32.gmra.mxu1 %v389_v35 }
  0x6f   : > { %599 = vmatprep.mubr.f32.mxu0 %v360_v36  ;;  %695 = vmatprep.mubr.f32.mxu1 %v392_v37 }
  0x72   : > { %600 = vmatmul.mubr.f32.gmra.mxu0 %v359_v38  ;;  %696 = vmatmul.mubr.f32.gmra.mxu1 %v391_v39 }
  0x73   : > { %605 = vmatprep.mubr.f32.mxu0 %v362_v40  ;;  %701 = vmatprep.mubr.f32.mxu1 %v394_v41 }
  0x76   : > { %606 = vmatmul.mubr.f32.gmra.mxu0 %v361_v42  ;;  %702 = vmatmul.mubr.f32.gmra.mxu1 %v393_v43 }
  0x77   : > { %611 = vmatprep.mubr.f32.mxu0 %v364_v44  ;;  %707 = vmatprep.mubr.f32.mxu1 %v396_v45 }
  0x7a   : > { %612 = vmatmul.mubr.f32.gmra.mxu0 %v363_v46  ;;  %708 = vmatmul.mubr.f32.gmra.mxu1 %v395_v47 }
  0x7b   : > { %617 = vmatprep.mubr.f32.mxu0 %v366_v48  ;;  %713 = vmatprep.mubr.f32.mxu1 %v398_v49 }
  0x7e   : > { %618 = vmatmul.mubr.f32.gmra.mxu0 %v365_v50  ;;  %714 = vmatmul.mubr.f32.gmra.mxu1 %v397_v51 }
  0x7f   : > { %623 = vmatprep.mubr.f32.mxu0 %v368_v52  ;;  %719 = vmatprep.mubr.f32.mxu1 %v400_v53 }
  0x82   : > { %624 = vmatmul.mubr.f32.gmra.mxu0 %v367_v54  ;;  %720 = vmatmul.mubr.f32.gmra.mxu1 %v399_v55 }
  0x83   : > { %629 = vmatprep.mubr.f32.mxu0 %v370_v56  ;;  %725 = vmatprep.mubr.f32.mxu1 %v402_v57 }
  0x86   : > { %630 = vmatmul.mubr.f32.gmra.mxu0 %v369_v58  ;;  %726 = vmatmul.mubr.f32.gmra.mxu1 %v401_v59 }
  0x87   : > { %635 = vmatprep.mubr.f32.mxu0 %v372_v60  ;;  %731 = vmatprep.mubr.f32.mxu1 %v404_v61 }
  0x8a   : > { %636 = vmatmul.mubr.f32.gmra.mxu0 %v371_v62  ;;  %732 = vmatmul.mubr.f32.gmra.mxu1 %v403_v63 }
 0x10e   : > { %v547_v8 = vpop.f32.mrf.mxu0  ;;  %v643_v9 = vpop.f32.mrf.mxu1 }
 0x10f   : > { %v548_v10 = vadd.f32 %v547_v8, %v2079_v6  ;;  %v644_v14 = vadd.f32 %v643_v9, %v2079_v6 }
 0x110   : > { %v549_v12 = vpop.f32.mrf.mxu0  ;;  %v645_v13 = vpop.f32.mrf.mxu1 }
 0x111   : > { %v550_v15 = vadd.f32 %v549_v12, %v2081_v7  ;;  %v646_v16 = vadd.f32 %v645_v13, %v2081_v7  ;;  %v738_v17 = vmax.f32 %v548_v10, 0.0  ;;  %v770_v27 = vmax.f32 %v644_v14, 0.0 }
 0x112   : > { %v553_v20 = vpop.f32.mrf.mxu0  ;;  %v649_v21 = vpop.f32.mrf.mxu1 }
 0x113   : > { %v739_v22 = vmax.f32 %v550_v15, 0.0  ;;  %v771_v23 = vmax.f32 %v646_v16, 0.0  ;;  %v650_v24 = vadd.f32 %v649_v21, %v2079_v6  ;;  %v554_v28 = vadd.f32 %v553_v20, %v2079_v6 }
 0x114   : > { %v555_v25 = vpop.f32.mrf.mxu0  ;;  %v651_v26 = vpop.f32.mrf.mxu1  ;;  %v846_v34 = vmul.f32 %v2090_v18, %v738_v17  ;;  %v878_v44 = vmul.f32 %v2090_v18, %v770_v27 }
 0x115   : > { %v556_v29 = vadd.f32 %v555_v25, %v2081_v7  ;;  %v652_v30 = vadd.f32 %v651_v26, %v2081_v7  ;;  %v772_v31 = vmax.f32 %v650_v24, 0.0  ;;  %v847_v35 = vmul.f32 %v2092_v19, %v739_v22 }
 0x116   : > { %v559_v32 = vpop.f32.mrf.mxu0  ;;  %v655_v33 = vpop.f32.mrf.mxu1  ;;  %v879_v36 = vmul.f32 %v2092_v19, %v771_v23  ;;  %v740_v45 = vmax.f32 %v554_v28, 0.0 }
 0x117   : > { %v773_v37 = vmax.f32 %v652_v30, 0.0  ;;  %v560_v38 = vadd.f32 %v559_v32, %v2079_v6  ;;  %v741_v39 = vmax.f32 %v556_v29, 0.0  ;;  %v656_v41 = vadd.f32 %v655_v33, %v2079_v6 }
 0x118   : > { %v561_v40 = vpop.f32.mrf.mxu0  ;;  %v910_v42 = vadd.f32 %v847_v35, %v846_v34  ;;  %v657_v43 = vpop.f32.mrf.mxu1  ;;  %v880_v51 = vmul.f32 %v2090_v18, %v772_v31  ;;  %v958_v56 = vadd.f32 %v879_v36, %v878_v44  ;;  %v848_v63 = vmul.f32 %v2090_v18, %v740_v45 }
 0x119   : > { %v562_v46 = vadd.f32 %v561_v40, %v2081_v7  ;;  %v658_v47 = vadd.f32 %v657_v43, %v2081_v7  ;;  %v742_v48 = vmax.f32 %v560_v38, 0.0  ;;  %v881_v52 = vmul.f32 %v2092_v19, %v773_v37 }
 0x11a   : > { %911 = vadd.xlane.f32.xlu0 %v910_v42  ;;  %v565_v49 = vpop.f32.mrf.mxu0  ;;  %v661_v50 = vpop.f32.mrf.mxu1  ;;  %v774_v54 = vmax.f32 %v656_v41, 0.0  ;;  %v849_v57 = vmul.f32 %v2092_v19, %v741_v39 }
 0x11b   : > { %v743_v53 = vmax.f32 %v562_v46, 0.0  ;;  %v566_v55 = vadd.f32 %v565_v49, %v2079_v6  ;;  %v775_v58 = vmax.f32 %v658_v47, 0.0  ;;  %v662_v60 = vadd.f32 %v661_v50, %v2079_v6 }
 0x11c   : > { %v567_v59 = vpop.f32.mrf.mxu0  ;;  %v961_v61 = vadd.f32 %v881_v52, %v880_v51  ;;  %v663_v62 = vpop.f32.mrf.mxu1  ;;  %v850_v2 = vmul.f32 %v2090_v18, %v742_v48  ;;  %v882_v10 = vmul.f32 %v2090_v18, %v774_v54  ;;  %v913_v20 = vadd.f32 %v849_v57, %v848_v63 }
 0x11d   : > { %v851_v0 = vmul.f32 %v2092_v19, %v743_v53  ;;  %v568_v1 = vadd.f32 %v567_v59, %v2081_v7  ;;  %v744_v3 = vmax.f32 %v566_v55, 0.0  ;;  %v776_v4 = vmax.f32 %v662_v60, 0.0 }
 0x11e   : > { %962 = vadd.xlane.f32.xlu1 %v961_v61  ;;  %959 = vadd.xlane.f32.xlu0 %v958_v56  ;;  %v571_v5 = vpop.f32.mrf.mxu0  ;;  %v664_v8 = vadd.f32 %v663_v62, %v2081_v7  ;;  %v667_v9 = vpop.f32.mrf.mxu1  ;;  %v883_v14 = vmul.f32 %v2092_v19, %v775_v58 }
 0x11f   : > { %v745_v11 = vmax.f32 %v568_v1, 0.0  ;;  %v572_v12 = vadd.f32 %v571_v5, %v2079_v6  ;;  %v668_v13 = vadd.f32 %v667_v9, %v2079_v6  ;;  %v916_v17 = vadd.f32 %v851_v0, %v850_v2 }
 0x120   : > { %v777_v15 = vmax.f32 %v664_v8, 0.0  ;;  %v573_v16 = vpop.f32.mrf.mxu0  ;;  %v669_v21 = vpop.f32.mrf.mxu1  ;;  %v852_v24 = vmul.f32 %v2090_v18, %v744_v3  ;;  %v884_v25 = vmul.f32 %v2090_v18, %v776_v4  ;;  %v964_v38 = vadd.f32 %v883_v14, %v882_v10 }
 0x121   : > { %v853_v22 = vmul.f32 %v2092_v19, %v745_v11  ;;  %v574_v23 = vadd.f32 %v573_v16, %v2081_v7  ;;  %v746_v26 = vmax.f32 %v572_v12, 0.0  ;;  %v670_v28 = vadd.f32 %v669_v21, %v2081_v7 }
 0x122   : > { %917 = vadd.xlane.f32.xlu1 %v916_v17  ;;  %914 = vadd.xlane.f32.xlu0 %v913_v20  ;;  %v577_v27 = vpop.f32.mrf.mxu0  ;;  %v673_v29 = vpop.f32.mrf.mxu1  ;;  %v885_v30 = vmul.f32 %v2092_v19, %v777_v15  ;;  %v778_v32 = vmax.f32 %v668_v13, 0.0 }
 0x123   : > { %v747_v31 = vmax.f32 %v574_v23, 0.0  ;;  %v578_v33 = vadd.f32 %v577_v27, %v2079_v6  ;;  %v779_v34 = vmax.f32 %v670_v28, 0.0  ;;  %v674_v36 = vadd.f32 %v673_v29, %v2079_v6 }
 0x124   : > { %v579_v35 = vpop.f32.mrf.mxu0  ;;  %v919_v37 = vadd.f32 %v853_v22, %v852_v24  ;;  %v675_v39 = vpop.f32.mrf.mxu1  ;;  %v854_v43 = vmul.f32 %v2090_v18, %v746_v26  ;;  %v886_v48 = vmul.f32 %v2090_v18, %v778_v32  ;;  %v967_v51 = vadd.f32 %v885_v30, %v884_v25 }
 0x125   : > { %v855_v40 = vmul.f32 %v2092_v19, %v747_v31  ;;  %v580_v41 = vadd.f32 %v579_v35, %v2081_v7  ;;  %v676_v42 = vadd.f32 %v675_v39, %v2081_v7  ;;  %v748_v44 = vmax.f32 %v578_v33, 0.0 }
 0x126   : > { %v780_v45 = vmax.f32 %v674_v36, 0.0  ;;  %920 = vadd.xlane.f32.xlu1 %v919_v37  ;;  %965 = vadd.xlane.f32.xlu0 %v964_v38  ;;  %v583_v46 = vpop.f32.mrf.mxu0  ;;  %v679_v47 = vpop.f32.mrf.mxu1  ;;  %v887_v52 = vmul.f32 %v2092_v19, %v779_v34 }
 0x127   : > { %v749_v49 = vmax.f32 %v580_v41, 0.0  ;;  %v584_v50 = vadd.f32 %v583_v46, %v2079_v6  ;;  %v781_v53 = vmax.f32 %v676_v42, 0.0  ;;  %v680_v55 = vadd.f32 %v679_v47, %v2079_v6 }
 0x128   : > { %v585_v54 = vpop.f32.mrf.mxu0  ;;  %v922_v56 = vadd.f32 %v855_v40, %v854_v43  ;;  %v681_v57 = vpop.f32.mrf.mxu1  ;;  %v856_v60 = vmul.f32 %v2090_v18, %v748_v44  ;;  %v888_v61 = vmul.f32 %v2090_v18, %v780_v45  ;;  %v970_v12 = vadd.f32 %v887_v52, %v886_v48 }
 0x129   : > { %v857_v58 = vmul.f32 %v2092_v19, %v749_v49  ;;  %v586_v59 = vadd.f32 %v585_v54, %v2081_v7  ;;  %v750_v62 = vmax.f32 %v584_v50, 0.0  ;;  %v682_v0 = vadd.f32 %v681_v57, %v2081_v7 }
 0x12a   : > { %968 = vadd.xlane.f32.xlu1 %v967_v51  ;;  %923 = vadd.xlane.f32.xlu0 %v922_v56  ;;  %v589_v63 = vpop.f32.mrf.mxu0  ;;  %v685_v1 = vpop.f32.mrf.mxu1  ;;  %v782_v3 = vmax.f32 %v680_v55, 0.0  ;;  %v889_v8 = vmul.f32 %v2092_v19, %v781_v53 }
 0x12b   : > { %v751_v2 = vmax.f32 %v586_v59, 0.0  ;;  %v590_v4 = vadd.f32 %v589_v63, %v2079_v6  ;;  %v686_v5 = vadd.f32 %v685_v1, %v2079_v6  ;;  %v783_v9 = vmax.f32 %v682_v0, 0.0 }
 0x12c   : > { %v591_v10 = vpop.f32.mrf.mxu0  ;;  %v925_v11 = vadd.f32 %v857_v58, %v856_v60  ;;  %v687_v13 = vpop.f32.mrf.mxu1  ;;  %v858_v16 = vmul.f32 %v2090_v18, %v750_v62  ;;  %v890_v24 = vmul.f32 %v2090_v18, %v782_v3  ;;  %v973_v31 = vadd.f32 %v889_v8, %v888_v61 }
 0x12d   : > { %v859_v14 = vmul.f32 %v2092_v19, %v751_v2  ;;  %v592_v15 = vadd.f32 %v591_v10, %v2081_v7  ;;  %v752_v17 = vmax.f32 %v590_v4, 0.0  ;;  %v784_v20 = vmax.f32 %v686_v5, 0.0 }
 0x12e   : > { %926 = vadd.xlane.f32.xlu1 %v925_v11  ;;  %971 = vadd.xlane.f32.xlu0 %v970_v12  ;;  %v595_v21 = vpop.f32.mrf.mxu0  ;;  %v688_v22 = vadd.f32 %v687_v13, %v2081_v7  ;;  %v691_v23 = vpop.f32.mrf.mxu1  ;;  %v891_v25 = vmul.f32 %v2092_v19, %v783_v9 }
 0x12f   : > { %v753_v26 = vmax.f32 %v592_v15, 0.0  ;;  %v596_v27 = vadd.f32 %v595_v21, %v2079_v6  ;;  %v692_v30 = vadd.f32 %v691_v23, %v2079_v6  ;;  %v928_v32 = vadd.f32 %v859_v14, %v858_v16 }
 0x130   : > { %v785_v28 = vmax.f32 %v688_v22, 0.0  ;;  %v597_v29 = vpop.f32.mrf.mxu0  ;;  %v693_v33 = vpop.f32.mrf.mxu1  ;;  %v860_v37 = vmul.f32 %v2090_v18, %v752_v17  ;;  %v892_v38 = vmul.f32 %v2090_v18, %v784_v20  ;;  %v976_v45 = vadd.f32 %v891_v25, %v890_v24 }
 0x131   : > { %v861_v34 = vmul.f32 %v2092_v19, %v753_v26  ;;  %v598_v35 = vadd.f32 %v597_v29, %v2081_v7  ;;  %v694_v36 = vadd.f32 %v693_v33, %v2081_v7  ;;  %v754_v39 = vmax.f32 %v596_v27, 0.0 }
 0x132   : > { %974 = vadd.xlane.f32.xlu1 %v973_v31  ;;  %929 = vadd.xlane.f32.xlu0 %v928_v32  ;;  %v601_v40 = vpop.f32.mrf.mxu0  ;;  %v697_v41 = vpop.f32.mrf.mxu1  ;;  %v786_v43 = vmax.f32 %v692_v30, 0.0  ;;  %v893_v46 = vmul.f32 %v2092_v19, %v785_v28 }
 0x133   : > { %v755_v42 = vmax.f32 %v598_v35, 0.0  ;;  %v602_v44 = vadd.f32 %v601_v40, %v2079_v6  ;;  %v787_v47 = vmax.f32 %v694_v36, 0.0  ;;  %v698_v49 = vadd.f32 %v697_v41, %v2079_v6 }
 0x134   : > { %v603_v48 = vpop.f32.mrf.mxu0  ;;  %v931_v50 = vadd.f32 %v861_v34, %v860_v37  ;;  %v699_v51 = vpop.f32.mrf.mxu1  ;;  %v862_v54 = vmul.f32 %v2090_v18, %v754_v39  ;;  %v894_v60 = vmul.f32 %v2090_v18, %v786_v43  ;;  %v979_v3 = vadd.f32 %v893_v46, %v892_v38 }
 0x135   : > { %v863_v52 = vmul.f32 %v2092_v19, %v755_v42  ;;  %v604_v53 = vadd.f32 %v603_v48, %v2081_v7  ;;  %v756_v55 = vmax.f32 %v602_v44, 0.0  ;;  %v788_v56 = vmax.f32 %v698_v49, 0.0 }
 0x136   : > { %932 = vadd.xlane.f32.xlu1 %v931_v50  ;;  %977 = vadd.xlane.f32.xlu0 %v976_v45  ;;  %v607_v57 = vpop.f32.mrf.mxu0  ;;  %v700_v58 = vadd.f32 %v699_v51, %v2081_v7  ;;  %v703_v59 = vpop.f32.mrf.mxu1  ;;  %v895_v0 = vmul.f32 %v2092_v19, %v787_v47 }
 0x137   : > { %v757_v61 = vmax.f32 %v604_v53, 0.0  ;;  %v608_v62 = vadd.f32 %v607_v57, %v2079_v6  ;;  %v704_v63 = vadd.f32 %v703_v59, %v2079_v6  ;;  %v934_v4 = vadd.f32 %v863_v52, %v862_v54 }
 0x138   : > { %v789_v1 = vmax.f32 %v700_v58, 0.0  ;;  %v609_v2 = vpop.f32.mrf.mxu0  ;;  %v705_v5 = vpop.f32.mrf.mxu1  ;;  %v864_v10 = vmul.f32 %v2090_v18, %v756_v55  ;;  %v896_v11 = vmul.f32 %v2090_v18, %v788_v56  ;;  %v982_v26 = vadd.f32 %v895_v0, %v894_v60 }
 0x139   : > { %v865_v8 = vmul.f32 %v2092_v19, %v757_v61  ;;  %v610_v9 = vadd.f32 %v609_v2, %v2081_v7  ;;  %v758_v12 = vmax.f32 %v608_v62, 0.0  ;;  %v706_v14 = vadd.f32 %v705_v5, %v2081_v7 }
 0x13a   : > { %980 = vadd.xlane.f32.xlu1 %v979_v3  ;;  %935 = vadd.xlane.f32.xlu0 %v934_v4  ;;  %v613_v13 = vpop.f32.mrf.mxu0  ;;  %v709_v15 = vpop.f32.mrf.mxu1  ;;  %v897_v16 = vmul.f32 %v2092_v19, %v789_v1  ;;  %v790_v20 = vmax.f32 %v704_v63, 0.0 }
 0x13b   : > { %v759_v17 = vmax.f32 %v610_v9, 0.0  ;;  %v614_v21 = vadd.f32 %v613_v13, %v2079_v6  ;;  %v791_v22 = vmax.f32 %v706_v14, 0.0  ;;  %v710_v24 = vadd.f32 %v709_v15, %v2079_v6 }
 0x13c   : > { %v615_v23 = vpop.f32.mrf.mxu0  ;;  %v937_v25 = vadd.f32 %v865_v8, %v864_v10  ;;  %v711_v27 = vpop.f32.mrf.mxu1  ;;  %v866_v31 = vmul.f32 %v2090_v18, %v758_v12  ;;  %v898_v36 = vmul.f32 %v2090_v18, %v790_v20  ;;  %v985_v39 = vadd.f32 %v897_v16, %v896_v11 }
 0x13d   : > { %v867_v28 = vmul.f32 %v2092_v19, %v759_v17  ;;  %v616_v29 = vadd.f32 %v615_v23, %v2081_v7  ;;  %v712_v30 = vadd.f32 %v711_v27, %v2081_v7  ;;  %v760_v32 = vmax.f32 %v614_v21, 0.0 }
 0x13e   : > { %v792_v33 = vmax.f32 %v710_v24, 0.0  ;;  %938 = vadd.xlane.f32.xlu1 %v937_v25  ;;  %983 = vadd.xlane.f32.xlu0 %v982_v26  ;;  %v619_v34 = vpop.f32.mrf.mxu0  ;;  %v715_v35 = vpop.f32.mrf.mxu1  ;;  %v899_v40 = vmul.f32 %v2092_v19, %v791_v22 }
 0x13f   : > { %v761_v37 = vmax.f32 %v616_v29, 0.0  ;;  %v620_v38 = vadd.f32 %v619_v34, %v2079_v6  ;;  %v793_v41 = vmax.f32 %v712_v30, 0.0  ;;  %v716_v43 = vadd.f32 %v715_v35, %v2079_v6 }
 0x140   : > { %v621_v42 = vpop.f32.mrf.mxu0  ;;  %v940_v44 = vadd.f32 %v867_v28, %v866_v31  ;;  %v717_v45 = vpop.f32.mrf.mxu1  ;;  %v868_v48 = vmul.f32 %v2090_v18, %v760_v32  ;;  %v900_v49 = vmul.f32 %v2090_v18, %v792_v33  ;;  %v988_v62 = vadd.f32 %v899_v40, %v898_v36 }
 0x141   : > { %v869_v46 = vmul.f32 %v2092_v19, %v761_v37  ;;  %v622_v47 = vadd.f32 %v621_v42, %v2081_v7  ;;  %v762_v50 = vmax.f32 %v620_v38, 0.0  ;;  %v718_v52 = vadd.f32 %v717_v45, %v2081_v7 }
 0x142   : > { %986 = vadd.xlane.f32.xlu1 %v985_v39  ;;  %941 = vadd.xlane.f32.xlu0 %v940_v44  ;;  %v625_v51 = vpop.f32.mrf.mxu0  ;;  %v721_v53 = vpop.f32.mrf.mxu1  ;;  %v794_v55 = vmax.f32 %v716_v43, 0.0  ;;  %v901_v58 = vmul.f32 %v2092_v19, %v793_v41 }
 0x143   : > { %v763_v54 = vmax.f32 %v622_v47, 0.0  ;;  %v626_v56 = vadd.f32 %v625_v51, %v2079_v6  ;;  %v722_v57 = vadd.f32 %v721_v53, %v2079_v6  ;;  %v795_v59 = vmax.f32 %v718_v52, 0.0 }
 0x144   : > { %v627_v60 = vpop.f32.mrf.mxu0  ;;  %v943_v61 = vadd.f32 %v869_v46, %v868_v48  ;;  %v723_v63 = vpop.f32.mrf.mxu1  ;;  %v870_v2 = vmul.f32 %v2090_v18, %v762_v50  ;;  %v902_v10 = vmul.f32 %v2090_v18, %v794_v55  ;;  %v991_v17 = vadd.f32 %v901_v58, %v900_v49 }
 0x145   : > { %v871_v0 = vmul.f32 %v2092_v19, %v763_v54  ;;  %v628_v1 = vadd.f32 %v627_v60, %v2081_v7  ;;  %v764_v3 = vmax.f32 %v626_v56, 0.0  ;;  %v796_v4 = vmax.f32 %v722_v57, 0.0  ;;  %v802_v57 = vld [vmem:[#allocation2] sm:$0xff]  ;;  %v819_v60 = vld [vmem:[#allocation2 + $0x88] sm:$0xff] }
 0x146   : > { %944 = vadd.xlane.f32.xlu1 %v943_v61  ;;  %989 = vadd.xlane.f32.xlu0 %v988_v62  ;;  %v631_v5 = vpop.f32.mrf.mxu0  ;;  %v724_v8 = vadd.f32 %v723_v63, %v2081_v7  ;;  %v727_v9 = vpop.f32.mrf.mxu1  ;;  %v903_v11 = vmul.f32 %v2092_v19, %v795_v59  ;;  %v818_v61 = vld [vmem:[#allocation2 + $0x80] sm:$0xff] }
 0x147   : > { %v765_v12 = vmax.f32 %v628_v1, 0.0  ;;  %v632_v13 = vadd.f32 %v631_v5, %v2079_v6  ;;  %v728_v16 = vadd.f32 %v727_v9, %v2079_v6  ;;  %v946_v20 = vadd.f32 %v871_v0, %v870_v2  ;;  %v804_v0 = vld [vmem:[#allocation2 + $0x10] sm:$0xff]  ;;  %v803_v1 = vld [vmem:[#allocation2 + $0x8] sm:$0xff] }
 0x148   : > { %v797_v14 = vmax.f32 %v724_v8, 0.0  ;;  %v633_v15 = vpop.f32.mrf.mxu0  ;;  %v729_v21 = vpop.f32.mrf.mxu1  ;;  %v872_v26 = vmul.f32 %v2090_v18, %v764_v3  ;;  %v904_v27 = vmul.f32 %v2090_v18, %v796_v4  ;;  %v994_v33 = vadd.f32 %v903_v11, %v902_v10  ;;  %v805_v10 = vld [vmem:[#allocation2 + $0x18] sm:$0xff]  ;;  %v820_v11 = vld [vmem:[#allocation2 + $0x90] sm:$0xff] }
 0x149   : > { %v873_v22 = vmul.f32 %v2092_v19, %v765_v12  ;;  %v766_v23 = vmax.f32 %v632_v13, 0.0  ;;  %v634_v24 = vadd.f32 %v633_v15, %v2081_v7  ;;  %v730_v25 = vadd.f32 %v729_v21, %v2081_v7 }
 0x14a   : > { %992 = vadd.xlane.f32.xlu1 %v991_v17  ;;  %947 = vadd.xlane.f32.xlu0 %v946_v20  ;;  %v637_v28 = vpop.f32.mrf.mxu0  ;;  %v733_v29 = vpop.f32.mrf.mxu1  ;;  %v798_v31 = vmax.f32 %v728_v16, 0.0  ;;  %v905_v34 = vmul.f32 %v2092_v19, %v797_v14  ;;  %v2221_v2 = vstv %s1106_s27 }
 0x14b   : > { %v767_v30 = vmax.f32 %v634_v24, 0.0  ;;  %v638_v32 = vadd.f32 %v637_v28, %v2079_v6  ;;  %v799_v35 = vmax.f32 %v730_v25, 0.0  ;;  %v734_v37 = vadd.f32 %v733_v29, %v2079_v6 }
 0x14c   : > { %v639_v36 = vpop.f32.mrf.mxu0  ;;  %v949_v38 = vadd.f32 %v873_v22, %v872_v26  ;;  %v735_v39 = vpop.f32.mrf.mxu1  ;;  %v874_v40 = vmul.f32 %v2090_v18, %v766_v23  ;;  %v906_v46 = vmul.f32 %v2090_v18, %v798_v31  ;;  %v997_v51 = vadd.f32 %v905_v34, %v904_v27  ;;  %v821_v22 = vld [vmem:[#allocation2 + $0x98] sm:$0xff]  ;;  %v806_v26 = vld [vmem:[#allocation2 + $0x20] sm:$0xff] }
 0x14d   : > { %v875_v41 = vmul.f32 %v2092_v19, %v767_v30  ;;  %v768_v42 = vmax.f32 %v638_v32, 0.0  ;;  %v640_v43 = vadd.f32 %v639_v36, %v2081_v7  ;;  %v800_v44 = vmax.f32 %v734_v37, 0.0 }
 0x14e   : > { %950 = vadd.xlane.f32.xlu1 %v949_v38  ;;  %995 = vadd.xlane.f32.xlu0 %v994_v33  ;;  %v736_v45 = vadd.f32 %v735_v39, %v2081_v7  ;;  %v907_v6 = vmul.f32 %v2092_v19, %v799_v35  ;;  %v807_v35 = vld [vmem:[#allocation2 + $0x28] sm:$0xff] }
 0x14f   : > { %v769_v47 = vmax.f32 %v640_v43, 0.0  ;;  %v952_v48 = vadd.f32 %v875_v41, %v874_v40  ;;  %v908_v49 = vmul.f32 %v2090_v18, %v800_v44  ;;  %v876_v52 = vmul.f32 %v2090_v18, %v768_v42  ;;  %v822_v40 = vld [vmem:[#allocation2 + $0xa0] sm:$0xff] }
 0x150   : > { %v801_v50 = vmax.f32 %v736_v45, 0.0  ;;  %v1000_v7 = vadd.f32 %v907_v6, %v906_v46  ;;  %v823_v6 = vld [vmem:[#allocation2 + $0xa8] sm:$0xff] }
 0x151   : > { %v877_v53 = vmul.f32 %v2092_v19, %v769_v47 }
 0x152   : > { %v909_v54 = vmul.f32 %v2092_v19, %v801_v50  ;;  %998 = vadd.xlane.f32.xlu1 %v997_v51  ;;  %953 = vadd.xlane.f32.xlu0 %v952_v48 }
 0x153   : > { %v955_v55 = vadd.f32 %v877_v53, %v876_v52  ;;  %v808_v53 = vld [vmem:[#allocation2 + $0x30] sm:$0xff] }
 0x154   : > { %v1003_v56 = vadd.f32 %v909_v54, %v908_v49 }
 0x156   : > { %956 = vadd.xlane.f32.xlu1 %v955_v55  ;;  %1001 = vadd.xlane.f32.xlu0 %v1000_v7 }
 0x15a   : > { %1004 = vadd.xlane.f32.xlu1 %v1003_v56 }
 0x1a3   : > { %v912_v58 = vpop.xlane.xlu0 %911 }
 0x1a4   : > { %v1006_v59 = vadd.f32 %v912_v58, %v802_v57 }
 0x1a6   : > { %1039 = vst.msk [vmem:[#allocation2] sm:$0xff] %vm308_vm0, %v1006_v59 }
 0x1a7   : > { %v963_v18 = vpop.xlane.xlu1 %962  ;;  %v960_v62 = vpop.xlane.xlu0 %959 }
 0x1a8   : > { %v1023_v63 = vadd.f32 %v963_v18, %v819_v60  ;;  %v1022_v19 = vadd.f32 %v960_v62, %v818_v61  ;;  %v809_v60 = vld [vmem:[#allocation2 + $0x38] sm:$0xff]  ;;  %v824_v61 = vld [vmem:[#allocation2 + $0xb0] sm:$0xff] }
 0x1aa   : > { %1056 = vst.msk [vmem:[#allocation2 + $0x88] sm:$0xff] %vm308_vm0, %v1023_v63  ;;  %1055 = vst.msk [vmem:[#allocation2 + $0x80] sm:$0xff] %vm308_vm0, %v1022_v19 }
 0x1ab   : > { %v918_v3 = vpop.xlane.xlu1 %917  ;;  %v915_v4 = vpop.xlane.xlu0 %914 }
 0x1ac   : > { %v1008_v5 = vadd.f32 %v918_v3, %v804_v0  ;;  %v1007_v8 = vadd.f32 %v915_v4, %v803_v1 }
 0x1ad   : > { %v1074_v9 = vld [vmem:[#allocation2] sm:$0xff] }
 0x1ae   : > { %v1108_v12 = vadd.f32 %v2221_v2, %v1074_v9  ;;  %1041 = vst.msk [vmem:[#allocation2 + $0x10] sm:$0xff] %vm308_vm0, %v1008_v5  ;;  %1040 = vst.msk [vmem:[#allocation2 + $0x8] sm:$0xff] %vm308_vm0, %v1007_v8 }
 0x1af   : > { %v921_v13 = vpop.xlane.xlu1 %920  ;;  %v966_v14 = vpop.xlane.xlu0 %965 }
 0x1b0   : > { %v1140_v15 = vsub.f32 0.0, %v1108_v12  ;;  %v1009_v16 = vadd.f32 %v921_v13, %v805_v10  ;;  %v1024_v17 = vadd.f32 %v966_v14, %v820_v11  ;;  %v825_v12 = vld [vmem:[#allocation2 + $0xb8] sm:$0xff]  ;;  %v810_v13 = vld [vmem:[#allocation2 + $0x40] sm:$0xff] }
 0x1b1   : > { %v1091_v20 = vld [vmem:[#allocation2 + $0x88] sm:$0xff]  ;;  %v1090_v21 = vld [vmem:[#allocation2 + $0x80] sm:$0xff] }
 0x1b2   : > { %v1172_v23 = vmul.f32 1.442695, %v1140_v15  ;;  %v1125_v24 = vadd.f32 %v2221_v2, %v1091_v20  ;;  %v1124_v25 = vadd.f32 %v2221_v2, %v1090_v21  ;;  %1042 = vst.msk [vmem:[#allocation2 + $0x18] sm:$0xff] %vm308_vm0, %v1009_v16  ;;  %1057 = vst.msk [vmem:[#allocation2 + $0x90] sm:$0xff] %vm308_vm0, %v1024_v17 }
 0x1b3   : > { %v969_v27 = vpop.xlane.xlu1 %968  ;;  %v924_v28 = vpop.xlane.xlu0 %923 }
 0x1b4   : > { %1573 = vpow2.f32 %v1172_v23  ;;  %v1157_v29 = vsub.f32 0.0, %v1125_v24  ;;  %v1156_v30 = vsub.f32 0.0, %v1124_v25  ;;  %v1025_v31 = vadd.f32 %v969_v27, %v821_v22 }
 0x1b5   : > { %v1076_v32 = vld [vmem:[#allocation2 + $0x10] sm:$0xff]  ;;  %v1075_v33 = vld [vmem:[#allocation2 + $0x8] sm:$0xff]  ;;  %v1010_v34 = vadd.f32 %v924_v28, %v806_v26 }
 0x1b6   : > { %v1206_v36 = vmul.f32 1.442695, %v1157_v29  ;;  %v1204_v37 = vmul.f32 1.442695, %v1156_v30  ;;  %v1110_v38 = vadd.f32 %v2221_v2, %v1076_v32  ;;  %v1109_v39 = vadd.f32 %v2221_v2, %v1075_v33  ;;  %1058 = vst.msk [vmem:[#allocation2 + $0x98] sm:$0xff] %vm308_vm0, %v1025_v31  ;;  %v811_v30 = vld [vmem:[#allocation2 + $0x48] sm:$0xff] }
 0x1b7   : > { %1043 = vst.msk [vmem:[#allocation2 + $0x20] sm:$0xff] %vm308_vm0, %v1010_v34  ;;  %v927_v41 = vpop.xlane.xlu1 %926  ;;  %v972_v42 = vpop.xlane.xlu0 %971  ;;  %v826_v31 = vld [vmem:[#allocation2 + $0xc0] sm:$0xff] }
 0x1b8   : > { %1575 = vpow2.f32 %v1206_v36  ;;  %v1142_v43 = vsub.f32 0.0, %v1110_v38  ;;  %v1141_v44 = vsub.f32 0.0, %v1109_v39  ;;  %v1011_v45 = vadd.f32 %v927_v41, %v807_v35 }
 0x1b9   : > { %1577 = vpow2.f32 %v1204_v37  ;;  %v1077_v46 = vld [vmem:[#allocation2 + $0x18] sm:$0xff]  ;;  %v1092_v47 = vld [vmem:[#allocation2 + $0x90] sm:$0xff]  ;;  %v1026_v48 = vadd.f32 %v972_v42, %v822_v40 }
 0x1ba   : > { %v1176_v49 = vmul.f32 1.442695, %v1142_v43  ;;  %v1174_v50 = vmul.f32 1.442695, %v1141_v44  ;;  %v1111_v51 = vadd.f32 %v2221_v2, %v1077_v46  ;;  %v1126_v52 = vadd.f32 %v2221_v2, %v1092_v47  ;;  %1044 = vst.msk [vmem:[#allocation2 + $0x28] sm:$0xff] %vm308_vm0, %v1011_v45  ;;  %v827_v45 = vld [vmem:[#allocation2 + $0xc8] sm:$0xff] }
 0x1bb   : > { %1059 = vst.msk [vmem:[#allocation2 + $0xa0] sm:$0xff] %vm308_vm0, %v1026_v48  ;;  %v975_v54 = vpop.xlane.xlu1 %974  ;;  %v930_v55 = vpop.xlane.xlu0 %929 }
 0x1bc   : > { %1579 = vpow2.f32 %v1176_v49  ;;  %v1143_v7 = vsub.f32 0.0, %v1111_v51  ;;  %v1158_v56 = vsub.f32 0.0, %v1126_v52  ;;  %v1027_v57 = vadd.f32 %v975_v54, %v823_v6  ;;  %v812_v49 = vld [vmem:[#allocation2 + $0x50] sm:$0xff] }
 0x1bd   : > { %1581 = vpow2.f32 %v1174_v50  ;;  %v1093_v58 = vld [vmem:[#allocation2 + $0x98] sm:$0xff]  ;;  %v1012_v59 = vadd.f32 %v930_v55, %v808_v53 }
 0x1be   : > { %v1178_v18 = vmul.f32 1.442695, %v1143_v7  ;;  %v1208_v62 = vmul.f32 1.442695, %v1158_v56  ;;  %v1127_v63 = vadd.f32 %v2221_v2, %v1093_v58  ;;  %v1078_v19 = vld [vmem:[#allocation2 + $0x20] sm:$0xff]  ;;  %1060 = vst.msk [vmem:[#allocation2 + $0xa8] sm:$0xff] %vm308_vm0, %v1027_v57 }
 0x1bf   : > { %v1112_v0 = vadd.f32 %v2221_v2, %v1078_v19  ;;  %1045 = vst.msk [vmem:[#allocation2 + $0x30] sm:$0xff] %vm308_vm0, %v1012_v59  ;;  %v933_v1 = vpop.xlane.xlu1 %932  ;;  %v978_v3 = vpop.xlane.xlu0 %977 }
 0x1c0   : > { %1583 = vpow2.f32 %v1178_v18  ;;  %v1159_v4 = vsub.f32 0.0, %v1127_v63  ;;  %v1013_v5 = vadd.f32 %v933_v1, %v809_v60  ;;  %v1028_v8 = vadd.f32 %v978_v3, %v824_v61  ;;  %v813_v61 = vld [vmem:[#allocation2 + $0x58] sm:$0xff] }
 0x1c1   : > { %v1574_v9 = vpop.eup %1573  ;;  %1585 = vpow2.f32 %v1208_v62  ;;  %v1144_v10 = vsub.f32 0.0, %v1112_v0  ;;  %v1079_v11 = vld [vmem:[#allocation2 + $0x28] sm:$0xff]  ;;  %v828_v0 = vld [vmem:[#allocation2 + $0xd0] sm:$0xff] }
 0x1c2   : > { %v1236_v14 = vadd.f32 1.0, %v1574_v9  ;;  %v1210_v15 = vmul.f32 1.442695, %v1159_v4  ;;  %v1113_v16 = vadd.f32 %v2221_v2, %v1079_v11  ;;  %v1094_v17 = vld [vmem:[#allocation2 + $0xa0] sm:$0xff]  ;;  %1046 = vst.msk [vmem:[#allocation2 + $0x38] sm:$0xff] %vm308_vm0, %v1013_v5  ;;  %1061 = vst.msk [vmem:[#allocation2 + $0xb0] sm:$0xff] %vm308_vm0, %v1028_v8 }
 0x1c3   : > { %v1180_v20 = vmul.f32 1.442695, %v1144_v10  ;;  %v1128_v21 = vadd.f32 %v2221_v2, %v1094_v17  ;;  %v981_v22 = vpop.xlane.xlu1 %980  ;;  %v936_v23 = vpop.xlane.xlu0 %935 }
 0x1c4   : > { %1587 = vrcp.f32 %v1236_v14  ;;  %v1145_v24 = vsub.f32 0.0, %v1113_v16  ;;  %v1029_v25 = vadd.f32 %v981_v22, %v825_v12  ;;  %v1014_v26 = vadd.f32 %v936_v23, %v810_v13 }
 0x1c5   : > { %v1576_v27 = vpop.eup %1575  ;;  %1589 = vpow2.f32 %v1210_v15  ;;  %v1160_v28 = vsub.f32 0.0, %v1128_v21  ;;  %v1095_v29 = vld [vmem:[#allocation2 + $0xa8] sm:$0xff] }
 0x1c6   : > { %v1578_v32 = vpop.eup %1577  ;;  %v1253_v33 = vadd.f32 1.0, %v1576_v27  ;;  %1591 = vpow2.f32 %v1180_v20  ;;  %v1182_v34 = vmul.f32 1.442695, %v1145_v24  ;;  %v1129_v35 = vadd.f32 %v2221_v2, %v1095_v29  ;;  %v1080_v36 = vld [vmem:[#allocation2 + $0x30] sm:$0xff]  ;;  %1062 = vst.msk [vmem:[#allocation2 + $0xb8] sm:$0xff] %vm308_vm0, %v1029_v25  ;;  %1047 = vst.msk [vmem:[#allocation2 + $0x40] sm:$0xff] %vm308_vm0, %v1014_v26 }
 0x1c7   : > { %v1252_v37 = vadd.f32 1.0, %v1578_v32  ;;  %v1212_v38 = vmul.f32 1.442695, %v1160_v28  ;;  %v1114_v39 = vadd.f32 %v2221_v2, %v1080_v36  ;;  %v939_v40 = vpop.xlane.xlu1 %938  ;;  %v984_v41 = vpop.xlane.xlu0 %983  ;;  %v829_v26 = vld [vmem:[#allocation2 + $0xd8] sm:$0xff]  ;;  %v814_v27 = vld [vmem:[#allocation2 + $0x60] sm:$0xff] }
 0x1c8   : > { %1593 = vrcp.f32 %v1253_v33  ;;  %v1161_v42 = vsub.f32 0.0, %v1129_v35  ;;  %v1015_v43 = vadd.f32 %v939_v40, %v811_v30  ;;  %v1030_v44 = vadd.f32 %v984_v41, %v826_v31  ;;  %v815_v41 = vld [vmem:[#allocation2 + $0x68] sm:$0xff] }
 0x1c9   : > { %v1580_v46 = vpop.eup %1579  ;;  %1595 = vrcp.f32 %v1252_v37  ;;  %v1146_v47 = vsub.f32 0.0, %v1114_v39  ;;  %v1081_v48 = vld [vmem:[#allocation2 + $0x38] sm:$0xff]  ;;  %v1096_v6 = vld [vmem:[#allocation2 + $0xb0] sm:$0xff] }
 0x1ca   : > { %v1582_v50 = vpop.eup %1581  ;;  %v1238_v51 = vadd.f32 1.0, %v1580_v46  ;;  %1597 = vpow2.f32 %v1182_v34  ;;  %v1214_v52 = vmul.f32 1.442695, %v1161_v42  ;;  %v1115_v53 = vadd.f32 %v2221_v2, %v1081_v48  ;;  %1048 = vst.msk [vmem:[#allocation2 + $0x48] sm:$0xff] %vm308_vm0, %v1015_v43  ;;  %1063 = vst.msk [vmem:[#allocation2 + $0xc0] sm:$0xff] %vm308_vm0, %v1030_v44  ;;  %v830_v46 = vld [vmem:[#allocation2 + $0xe0] sm:$0xff] }
 0x1cb   : > { %v1237_v54 = vadd.f32 1.0, %v1582_v50  ;;  %1599 = vpow2.f32 %v1212_v38  ;;  %v1184_v55 = vmul.f32 1.442695, %v1146_v47  ;;  %v1130_v7 = vadd.f32 %v2221_v2, %v1096_v6  ;;  %v987_v56 = vpop.xlane.xlu1 %986  ;;  %v942_v57 = vpop.xlane.xlu0 %941 }
 0x1cc   : > { %1601 = vrcp.f32 %v1238_v51  ;;  %v1147_v58 = vsub.f32 0.0, %v1115_v53  ;;  %v1031_v59 = vadd.f32 %v987_v56, %v827_v45  ;;  %v1016_v60 = vadd.f32 %v942_v57, %v812_v49 }
 0x1cd   : > { %v1584_v18 = vpop.eup %1583  ;;  %1603 = vrcp.f32 %v1237_v54  ;;  %v1162_v62 = vsub.f32 0.0, %v1130_v7  ;;  %v1097_v63 = vld [vmem:[#allocation2 + $0xb8] sm:$0xff]  ;;  %v1082_v19 = vld [vmem:[#allocation2 + $0x40] sm:$0xff] }
 0x1ce   : > { %v1586_v1 = vpop.eup %1585  ;;  %v1239_v3 = vadd.f32 1.0, %v1584_v18  ;;  %1605 = vpow2.f32 %v1214_v52  ;;  %v1186_v4 = vmul.f32 1.442695, %v1147_v58  ;;  %v1131_v5 = vadd.f32 %v2221_v2, %v1097_v63  ;;  %1064 = vst.msk [vmem:[#allocation2 + $0xc8] sm:$0xff] %vm308_vm0, %v1031_v59  ;;  %1049 = vst.msk [vmem:[#allocation2 + $0x50] sm:$0xff] %vm308_vm0, %v1016_v60  ;;  %v816_v63 = vld [vmem:[#allocation2 + $0x70] sm:$0xff] }
 0x1cf   : > { %v1254_v8 = vadd.f32 1.0, %v1586_v1  ;;  %1607 = vpow2.f32 %v1184_v55  ;;  %v1216_v9 = vmul.f32 1.442695, %v1162_v62  ;;  %v1116_v10 = vadd.f32 %v2221_v2, %v1082_v19  ;;  %v945_v11 = vpop.xlane.xlu1 %944  ;;  %v990_v12 = vpop.xlane.xlu0 %989  ;;  %v831_v62 = vld [vmem:[#allocation2 + $0xe8] sm:$0xff] }
 0x1d0   : > { %1609 = vrcp.f32 %v1239_v3  ;;  %v1163_v13 = vsub.f32 0.0, %v1131_v5  ;;  %v1017_v14 = vadd.f32 %v945_v11, %v813_v61  ;;  %v1032_v15 = vadd.f32 %v990_v12, %v828_v0 }
 0x1d1   : > { %v1588_v16 = vpop.eup %1587  ;;  %1611 = vrcp.f32 %v1254_v8  ;;  %v1148_v17 = vsub.f32 0.0, %v1116_v10  ;;  %v1083_v20 = vld [vmem:[#allocation2 + $0x48] sm:$0xff]  ;;  %v1098_v21 = vld [vmem:[#allocation2 + $0xc0] sm:$0xff] }
 0x1d2   : > { %v1590_v22 = vpop.eup %1589  ;;  %1332 = vst.msk [vmem:[%s2261_s30] sm:$0xff] %vm308_vm0, %v1588_v16  ;;  %1613 = vpow2.f32 %v1186_v4  ;;  %v1218_v23 = vmul.f32 1.442695, %v1163_v13  ;;  %v1117_v24 = vadd.f32 %v2221_v2, %v1083_v20  ;;  %v1132_v25 = vadd.f32 %v2221_v2, %v1098_v21  ;;  %1050 = vst.msk [vmem:[#allocation2 + $0x58] sm:$0xff] %vm308_vm0, %v1017_v14  ;;  %v817_v14 = vld [vmem:[#allocation2 + $0x78] sm:$0xff] }
 0x1d3   : > { %1065 = vst.msk [vmem:[#allocation2 + $0xd0] sm:$0xff] %vm308_vm0, %v1032_v15  ;;  %v1592_v28 = vpop.eup %1591  ;;  %v1255_v29 = vadd.f32 1.0, %v1590_v22  ;;  %1615 = vpow2.f32 %v1216_v9  ;;  %v1188_v30 = vmul.f32 1.442695, %v1148_v17  ;;  %v993_v31 = vpop.xlane.xlu1 %992  ;;  %v832_v15 = vld [vmem:[#allocation2 + $0xf0] sm:$0xff] }
 0x1d4   : > { %v948_v32 = vpop.xlane.xlu0 %947  ;;  %v1240_v33 = vadd.f32 1.0, %v1592_v28  ;;  %1617 = vpow2.f32 %v1218_v23  ;;  %v1149_v34 = vsub.f32 0.0, %v1117_v24  ;;  %v1164_v35 = vsub.f32 0.0, %v1132_v25 }
 0x1d5   : > { %v1594_v36 = vpop.eup %1593  ;;  %1619 = vrcp.f32 %v1255_v29  ;;  %v1099_v37 = vld [vmem:[#allocation2 + $0xc8] sm:$0xff]  ;;  %v1084_v38 = vld [vmem:[#allocation2 + $0x50] sm:$0xff]  ;;  %v1033_v39 = vadd.f32 %v993_v31, %v829_v26  ;;  %v1018_v40 = vadd.f32 %v948_v32, %v814_v27 }
 0x1d6   : > { %v1596_v42 = vpop.eup %1595  ;;  %1349 = vst.msk [vmem:[%s2261_s30 + $0x88] sm:$0xff] %vm308_vm0, %v1594_v36  ;;  %1621 = vrcp.f32 %v1240_v33  ;;  %v1190_v43 = vmul.f32 1.442695, %v1149_v34  ;;  %v1220_v44 = vmul.f32 1.442695, %v1164_v35  ;;  %v1133_v45 = vadd.f32 %v2221_v2, %v1099_v37  ;;  %v833_v37 = vld [vmem:[#allocation2 + $0xf8] sm:$0xff] }
 0x1d7   : > { %v1598_v47 = vpop.eup %1597  ;;  %1348 = vst.msk [vmem:[%s2261_s30 + $0x80] sm:$0xff] %vm308_vm0, %v1596_v42  ;;  %1623 = vpow2.f32 %v1188_v30  ;;  %v1118_v48 = vadd.f32 %v2221_v2, %v1084_v38  ;;  %1066 = vst.msk [vmem:[#allocation2 + $0xd8] sm:$0xff] %vm308_vm0, %v1033_v39  ;;  %v951_v6 = vpop.xlane.xlu1 %950 }
 0x1d8   : > { %1051 = vst.msk [vmem:[#allocation2 + $0x60] sm:$0xff] %vm308_vm0, %v1018_v40  ;;  %v996_v49 = vpop.xlane.xlu0 %995  ;;  %v1600_v50 = vpop.eup %1599  ;;  %v1241_v51 = vadd.f32 1.0, %v1598_v47  ;;  %1625 = vpow2.f32 %v1190_v43  ;;  %v1165_v52 = vsub.f32 0.0, %v1133_v45  ;;  %v1019_v53 = vadd.f32 %v951_v6, %v815_v41 }
 0x1d9   : > { %v1602_v54 = vpop.eup %1601  ;;  %v1256_v55 = vadd.f32 1.0, %v1600_v50  ;;  %1627 = vpow2.f32 %v1220_v44  ;;  %v1150_v7 = vsub.f32 0.0, %v1118_v48  ;;  %v1085_v56 = vld [vmem:[#allocation2 + $0x58] sm:$0xff]  ;;  %v1034_v58 = vadd.f32 %v996_v49, %v830_v46 }
 0x1da   : > { %v1100_v57 = vld [vmem:[#allocation2 + $0xd0] sm:$0xff]  ;;  %v1604_v59 = vpop.eup %1603  ;;  %1334 = vst.msk [vmem:[%s2261_s30 + $0x10] sm:$0xff] %vm308_vm0, %v1602_v54  ;;  %1629 = vrcp.f32 %v1241_v51  ;;  %v1222_v60 = vmul.f32 1.442695, %v1165_v52  ;;  %v1119_v61 = vadd.f32 %v2221_v2, %v1085_v56  ;;  %1052 = vst.msk [vmem:[#allocation2 + $0x68] sm:$0xff] %vm308_vm0, %v1019_v53 }
 0x1db   : > { %v1134_v18 = vadd.f32 %v2221_v2, %v1100_v57  ;;  %v1606_v19 = vpop.eup %1605  ;;  %1333 = vst.msk [vmem:[%s2261_s30 + $0x8] sm:$0xff] %vm308_vm0, %v1604_v59  ;;  %1631 = vrcp.f32 %v1256_v55  ;;  %v1192_v0 = vmul.f32 1.442695, %v1150_v7  ;;  %1067 = vst.msk [vmem:[#allocation2 + $0xe0] sm:$0xff] %vm308_vm0, %v1034_v58  ;;  %v999_v1 = vpop.xlane.xlu1 %998 }
 0x1dc   : > { %v954_v3 = vpop.xlane.xlu0 %953  ;;  %v1608_v4 = vpop.eup %1607  ;;  %v1257_v5 = vadd.f32 1.0, %v1606_v19  ;;  %1633 = vpow2.f32 %v1222_v60  ;;  %v1151_v8 = vsub.f32 0.0, %v1119_v61  ;;  %v1035_v12 = vadd.f32 %v999_v1, %v831_v62 }
 0x1dd   : > { %v1166_v9 = vsub.f32 0.0, %v1134_v18  ;;  %v1610_v10 = vpop.eup %1609  ;;  %v1242_v11 = vadd.f32 1.0, %v1608_v4  ;;  %1635 = vpow2.f32 %v1192_v0  ;;  %v1020_v13 = vadd.f32 %v954_v3, %v816_v63 }
 0x1de   : > { %v1612_v16 = vpop.eup %1611  ;;  %1335 = vst.msk [vmem:[%s2261_s30 + $0x18] sm:$0xff] %vm308_vm0, %v1610_v10  ;;  %1637 = vrcp.f32 %v1257_v5  ;;  %v1194_v17 = vmul.f32 1.442695, %v1151_v8  ;;  %v1101_v21 = vld [vmem:[#allocation2 + $0xd8] sm:$0xff]  ;;  %1068 = vst.msk [vmem:[#allocation2 + $0xe8] sm:$0xff] %vm308_vm0, %v1035_v12 }
 0x1df   : > { %v1224_v20 = vmul.f32 1.442695, %v1166_v9  ;;  %v1086_v22 = vld [vmem:[#allocation2 + $0x60] sm:$0xff]  ;;  %v1614_v23 = vpop.eup %1613  ;;  %1350 = vst.msk [vmem:[%s2261_s30 + $0x90] sm:$0xff] %vm308_vm0, %v1612_v16  ;;  %1639 = vrcp.f32 %v1242_v11  ;;  %v1135_v24 = vadd.f32 %v2221_v2, %v1101_v21  ;;  %1053 = vst.msk [vmem:[#allocation2 + $0x70] sm:$0xff] %vm308_vm0, %v1020_v13  ;;  %v957_v26 = vpop.xlane.xlu1 %956 }
 0x1e0   : > { %v1120_v25 = vadd.f32 %v2221_v2, %v1086_v22  ;;  %v1002_v27 = vpop.xlane.xlu0 %1001  ;;  %v1616_v28 = vpop.eup %1615  ;;  %v1243_v29 = vadd.f32 1.0, %v1614_v23  ;;  %1641 = vpow2.f32 %v1194_v17  ;;  %v1021_v30 = vadd.f32 %v957_v26, %v817_v14 }
 0x1e1   : > { %v1036_v31 = vadd.f32 %v1002_v27, %v832_v15  ;;  %v1618_v32 = vpop.eup %1617  ;;  %v1258_v33 = vadd.f32 1.0, %v1616_v28  ;;  %1643 = vpow2.f32 %v1224_v20  ;;  %v1167_v34 = vsub.f32 0.0, %v1135_v24  ;;  %v1087_v36 = vld [vmem:[#allocation2 + $0x68] sm:$0xff] }
 0x1e2   : > { %v1152_v35 = vsub.f32 0.0, %v1120_v25  ;;  %v1620_v38 = vpop.eup %1619  ;;  %1645 = vrcp.f32 %v1243_v29  ;;  %v1259_v39 = vadd.f32 1.0, %v1618_v32  ;;  %v1121_v40 = vadd.f32 %v2221_v2, %v1087_v36  ;;  %v1102_v41 = vld [vmem:[#allocation2 + $0xe0] sm:$0xff]  ;;  %1054 = vst.msk [vmem:[#allocation2 + $0x78] sm:$0xff] %vm308_vm0, %v1021_v30 }
 0x1e3   : > { %1069 = vst.msk [vmem:[#allocation2 + $0xf0] sm:$0xff] %vm308_vm0, %v1036_v31  ;;  %v1622_v42 = vpop.eup %1621  ;;  %1351 = vst.msk [vmem:[%s2261_s30 + $0x98] sm:$0xff] %vm308_vm0, %v1620_v38  ;;  %1647 = vrcp.f32 %v1258_v33  ;;  %v1226_v43 = vmul.f32 1.442695, %v1167_v34  ;;  %v1136_v45 = vadd.f32 %v2221_v2, %v1102_v41  ;;  %v1005_v46 = vpop.xlane.xlu1 %1004 }
 0x1e4   : > { %v1196_v44 = vmul.f32 1.442695, %v1152_v35  ;;  %v1624_v47 = vpop.eup %1623  ;;  %1336 = vst.msk [vmem:[%s2261_s30 + $0x20] sm:$0xff] %vm308_vm0, %v1622_v42  ;;  %1649 = vrcp.f32 %v1259_v39  ;;  %v1153_v48 = vsub.f32 0.0, %v1121_v40  ;;  %v1037_v6 = vadd.f32 %v1005_v46, %v833_v37 }
 0x1e5   : > { %v1626_v49 = vpop.eup %1625  ;;  %v1244_v50 = vadd.f32 1.0, %v1624_v47  ;;  %1651 = vpow2.f32 %v1226_v43  ;;  %v1168_v51 = vsub.f32 0.0, %v1136_v45  ;;  %v1103_v55 = vld [vmem:[#allocation2 + $0xe8] sm:$0xff] }
 0x1e6   : > { %v1628_v52 = vpop.eup %1627  ;;  %v1245_v53 = vadd.f32 1.0, %v1626_v49  ;;  %1653 = vpow2.f32 %v1196_v44  ;;  %v1198_v54 = vmul.f32 1.442695, %v1153_v48  ;;  %v1088_v7 = vld [vmem:[#allocation2 + $0x70] sm:$0xff]  ;;  %1070 = vst.msk [vmem:[#allocation2 + $0xf8] sm:$0xff] %vm308_vm0, %v1037_v6  ;;  %v1137_v59 = vadd.f32 %v2221_v2, %v1103_v55 }
 0x1e7   : > { %v1630_v56 = vpop.eup %1629  ;;  %1655 = vrcp.f32 %v1244_v50  ;;  %v1260_v57 = vadd.f32 1.0, %v1628_v52  ;;  %v1228_v58 = vmul.f32 1.442695, %v1168_v51  ;;  %v1122_v61 = vadd.f32 %v2221_v2, %v1088_v7 }
 0x1e8   : > { %v1632_v60 = vpop.eup %1631  ;;  %1337 = vst.msk [vmem:[%s2261_s30 + $0x28] sm:$0xff] %vm308_vm0, %v1630_v56  ;;  %1657 = vrcp.f32 %v1245_v53  ;;  %v1169_v62 = vsub.f32 0.0, %v1137_v59 }
 0x1e9   : > { %v1634_v18 = vpop.eup %1633  ;;  %1352 = vst.msk [vmem:[%s2261_s30 + $0xa0] sm:$0xff] %vm308_vm0, %v1632_v60  ;;  %1659 = vrcp.f32 %v1260_v57  ;;  %v1089_v63 = vld [vmem:[#allocation2 + $0x78] sm:$0xff]  ;;  %v1154_v3 = vsub.f32 0.0, %v1122_v61 }
 0x1ea   : > { %v1104_v19 = vld [vmem:[#allocation2 + $0xf0] sm:$0xff]  ;;  %v1636_v0 = vpop.eup %1635  ;;  %v1261_v1 = vadd.f32 1.0, %v1634_v18  ;;  %1661 = vpow2.f32 %v1198_v54  ;;  %v1123_v4 = vadd.f32 %v2221_v2, %v1089_v63  ;;  %v1230_v9 = vmul.f32 1.442695, %v1169_v62 }
 0x1eb   : > { %v1638_v5 = vpop.eup %1637  ;;  %v1246_v8 = vadd.f32 1.0, %v1636_v0  ;;  %1663 = vpow2.f32 %v1228_v58  ;;  %v1138_v10 = vadd.f32 %v2221_v2, %v1104_v19  ;;  %v1200_v12 = vmul.f32 1.442695, %v1154_v3 }
 0x1ec   : > { %v1640_v11 = vpop.eup %1639  ;;  %1353 = vst.msk [vmem:[%s2261_s30 + $0xa8] sm:$0xff] %vm308_vm0, %v1638_v5  ;;  %1665 = vrcp.f32 %v1261_v1  ;;  %v1155_v13 = vsub.f32 0.0, %v1123_v4 }
 0x1ed   : > { %v1642_v14 = vpop.eup %1641  ;;  %1338 = vst.msk [vmem:[%s2261_s30 + $0x30] sm:$0xff] %vm308_vm0, %v1640_v11  ;;  %1667 = vrcp.f32 %v1246_v8  ;;  %v1170_v15 = vsub.f32 0.0, %v1138_v10  ;;  %v1105_v16 = vld [vmem:[#allocation2 + $0xf8] sm:$0xff] }
 0x1ee   : > { %v1644_v17 = vpop.eup %1643  ;;  %v1247_v20 = vadd.f32 1.0, %v1642_v14  ;;  %1669 = vpow2.f32 %v1230_v9  ;;  %v1202_v21 = vmul.f32 1.442695, %v1155_v13  ;;  %v1139_v22 = vadd.f32 %v2221_v2, %v1105_v16 }
 0x1ef   : > { %v1646_v23 = vpop.eup %1645  ;;  %v1262_v24 = vadd.f32 1.0, %v1644_v17  ;;  %1671 = vpow2.f32 %v1200_v12  ;;  %v1232_v25 = vmul.f32 1.442695, %v1170_v15 }
 0x1f0   : > { %v1648_v26 = vpop.eup %1647  ;;  %1339 = vst.msk [vmem:[%s2261_s30 + $0x38] sm:$0xff] %vm308_vm0, %v1646_v23  ;;  %1673 = vrcp.f32 %v1247_v20  ;;  %v1171_v27 = vsub.f32 0.0, %v1139_v22 }
 0x1f1   : > { %v1650_v28 = vpop.eup %1649  ;;  %1354 = vst.msk [vmem:[%s2261_s30 + $0xb0] sm:$0xff] %vm308_vm0, %v1648_v26  ;;  %1675 = vrcp.f32 %v1262_v24 }
 0x1f2   : > { %v1652_v29 = vpop.eup %1651  ;;  %1355 = vst.msk [vmem:[%s2261_s30 + $0xb8] sm:$0xff] %vm308_vm0, %v1650_v28  ;;  %1677 = vpow2.f32 %v1202_v21  ;;  %v1234_v2 = vmul.f32 1.442695, %v1171_v27 }
 0x1f3   : > { %v1654_v30 = vpop.eup %1653  ;;  %v1263_v31 = vadd.f32 1.0, %v1652_v29  ;;  %1679 = vpow2.f32 %v1232_v25 }
 0x1f4   : > { %v1656_v32 = vpop.eup %1655  ;;  %v1248_v33 = vadd.f32 1.0, %v1654_v30  ;;  %1681 = vpow2.f32 %v1234_v2 }
 0x1f5   : > { %v1658_v34 = vpop.eup %1657  ;;  %1340 = vst.msk [vmem:[%s2261_s30 + $0x40] sm:$0xff] %vm308_vm0, %v1656_v32  ;;  %1683 = vrcp.f32 %v1263_v31 }
 0x1f6   : > { %v1660_v35 = vpop.eup %1659  ;;  %1341 = vst.msk [vmem:[%s2261_s30 + $0x48] sm:$0xff] %vm308_vm0, %v1658_v34  ;;  %1685 = vrcp.f32 %v1248_v33 }
 0x1f7   : > { %v1662_v36 = vpop.eup %1661  ;;  %1356 = vst.msk [vmem:[%s2261_s30 + $0xc0] sm:$0xff] %vm308_vm0, %v1660_v35 }
 0x1f8   : > { %v1664_v37 = vpop.eup %1663  ;;  %v1249_v38 = vadd.f32 1.0, %v1662_v36 }
 0x1f9   : > { %v1666_v39 = vpop.eup %1665  ;;  %v1264_v40 = vadd.f32 1.0, %v1664_v37 }
 0x1fa   : > { %v1668_v41 = vpop.eup %1667  ;;  %1357 = vst.msk [vmem:[%s2261_s30 + $0xc8] sm:$0xff] %vm308_vm0, %v1666_v39  ;;  %1687 = vrcp.f32 %v1249_v38 }
 0x1fb   : > { %v1670_v42 = vpop.eup %1669  ;;  %1342 = vst.msk [vmem:[%s2261_s30 + $0x50] sm:$0xff] %vm308_vm0, %v1668_v41  ;;  %1689 = vrcp.f32 %v1264_v40 }
 0x1fc   : > { %v1672_v43 = vpop.eup %1671  ;;  %v1265_v44 = vadd.f32 1.0, %v1670_v42 }
 0x1fd   : > { %v1674_v45 = vpop.eup %1673  ;;  %v1250_v46 = vadd.f32 1.0, %v1672_v43 }
 0x1fe   : > { %v1676_v47 = vpop.eup %1675  ;;  %1343 = vst.msk [vmem:[%s2261_s30 + $0x58] sm:$0xff] %vm308_vm0, %v1674_v45  ;;  %1691 = vrcp.f32 %v1265_v44 }
 0x1ff   : > { %v1678_v48 = vpop.eup %1677  ;;  %1358 = vst.msk [vmem:[%s2261_s30 + $0xd0] sm:$0xff] %vm308_vm0, %v1676_v47  ;;  %1693 = vrcp.f32 %v1250_v46 }
 0x200   : > { %v1680_v6 = vpop.eup %1679  ;;  %v1251_v49 = vadd.f32 1.0, %v1678_v48 }
 0x201   : > { %v1682_v50 = vpop.eup %1681  ;;  %v1266_v51 = vadd.f32 1.0, %v1680_v6 }
 0x202   : > { %v1684_v52 = vpop.eup %1683  ;;  %1695 = vrcp.f32 %v1251_v49  ;;  %v1267_v53 = vadd.f32 1.0, %v1682_v50 }
 0x203   : > { %v1686_v54 = vpop.eup %1685  ;;  %1359 = vst.msk [vmem:[%s2261_s30 + $0xd8] sm:$0xff] %vm308_vm0, %v1684_v52  ;;  %1697 = vrcp.f32 %v1266_v51 }
 0x204   : > { %1344 = vst.msk [vmem:[%s2261_s30 + $0x60] sm:$0xff] %vm308_vm0, %v1686_v54  ;;  %1699 = vrcp.f32 %v1267_v53 }
 0x207   : > { %v1688_v55 = vpop.eup %1687 }
 0x208   : > { %v1690_v7 = vpop.eup %1689  ;;  %1345 = vst.msk [vmem:[%s2261_s30 + $0x68] sm:$0xff] %vm308_vm0, %v1688_v55 }
 0x209   : > { %1360 = vst.msk [vmem:[%s2261_s30 + $0xe0] sm:$0xff] %vm308_vm0, %v1690_v7 }
 0x20b   : > { %v1692_v56 = vpop.eup %1691 }
 0x20c   : > { %v1694_v57 = vpop.eup %1693  ;;  %1361 = vst.msk [vmem:[%s2261_s30 + $0xe8] sm:$0xff] %vm308_vm0, %v1692_v56 }
 0x20d   : > { %1346 = vst.msk [vmem:[%s2261_s30 + $0x70] sm:$0xff] %vm308_vm0, %v1694_v57 }
 0x20f   : > { %v1696_v58 = vpop.eup %1695 }
 0x210   : > { %v1698_v59 = vpop.eup %1697  ;;  %1347 = vst.msk [vmem:[%s2261_s30 + $0x78] sm:$0xff] %vm308_vm0, %v1696_v58 }
 0x211   : > { %v1700_v60 = vpop.eup %1699  ;;  %1362 = vst.msk [vmem:[%s2261_s30 + $0xf0] sm:$0xff] %vm308_vm0, %v1698_v59 }
 0x212   : > { %1363 = vst.msk [vmem:[%s2261_s30 + $0xf8] sm:$0xff] %vm308_vm0, %v1700_v60 }
 0x213 PF: > { %s16_s22 = sadd.s32 1, %s1723_s22   ;;  %s2369_s20 = smov %s1719_s21 }
 0x214   : > { %p13_p5 = scmp.ge.s32.totalorder %s16_s22, 4   ;;  %s2370_s21 = smov %s2372_s4 }
 0x216   :  { %15 = sbr.rel (!%p13_p5) target bundleno = 2 (0x2), region = 87 }

</bundles_post_ra>
